<compile_context>
chip_gen: v7x
topology: tpu7x:2x2x1
jax: 0.10.0
libtpu: 0.0.40
codegen_flags: <defaults>
</compile_context>

<pallas_src>
import functools

import jax
import jax.numpy as jnp
import numpy as np
from jax import lax
from jax.experimental import pallas as pl
from jax.experimental.pallas import tpu as pltpu

EPS = 1e-6


def _srms(x):
    # SimpleRMSNorm: x / sqrt(mean(x^2, -1) + eps)   (no learnable scale)
    return x * lax.rsqrt(jnp.mean(x * x, axis=-1, keepdims=True) + EPS)


def _silu(x):
    return x * jax.nn.sigmoid(x)


# --------------------------------------------------------------------------------------
# VMEM budget / feature probes / tile picking
# --------------------------------------------------------------------------------------
@functools.lru_cache(maxsize=1)
def _vmem_limit_bytes():
    try:
        cap = int(pltpu.get_tpu_info().vmem_capacity_bytes)
        # leave headroom for Mosaic internal scratch / double buffers:
        #   128 MiB chips (v5e/v6e) -> 96 MiB ; 64 MiB chips (v7x) -> 48 MiB
        return max(32 * 1024 * 1024, min(3 * cap // 4, 100 * 1024 * 1024))
    except Exception:
        return 64 * 1024 * 1024  # conservative known-good fallback


@functools.lru_cache(maxsize=1)
def _single_buffer_weights_supported():
    """Probe whether BlockSpec(pipeline_mode=pl.Buffered(1)) compiles & runs here."""
    try:
        def _copy(x_ref, w_ref, o_ref):
            o_ref[...] = x_ref[...] + w_ref[...]

        f = pl.pallas_call(
            _copy,
            out_shape=jax.ShapeDtypeStruct((32, 128), jnp.float32),
            grid=(4,),
            in_specs=[
                pl.BlockSpec((8, 128), lambda i: (i, 0)),
                pl.BlockSpec((8, 128), lambda i: (0, 0),
                             pipeline_mode=pl.Buffered(1)),
            ],
            out_specs=pl.BlockSpec((8, 128), lambda i: (i, 0)),
        )
        jax.block_until_ready(
            f(jnp.zeros((32, 128), jnp.float32), jnp.zeros((8, 128), jnp.float32)))
        return True
    except Exception:
        return False


def _pick_tile(n, d, n_head, vmem_limit, requested):
    """Largest chunk that divides N and fits the per-step VMEM budget."""
    if requested is not None:
        assert n % requested == 0, (n, requested)
        return requested
    e = d // n_head
    weight_bytes = 2 * 2 * (d * d + 4 * d * d + 2 * d * d)   # bf16, worst-case 2-buffered
    state_bytes = 4 * n_head * (2 * e) * e                   # f32 KV state
    cands = [t for t in (512, 256, 128, 64, 32, 16, 8) if n % t == 0] or [n]
    for tc in cands:
        act_bytes = 2 * (24 * tc * d)                        # 2-buffered activation blocks
        scratch_bytes = 4 * tc * d                           # merged-heads buffer
        if weight_bytes + state_bytes + act_bytes + scratch_bytes <= vmem_limit // 2:
            return tc
    return cands[-1]


# --------------------------------------------------------------------------------------
# Pass 1: qkvu = SRMS(x) @ W_qkvu ; silu on q,k ; Lrpe applied here (cos/sin computed
#         once per position, in f32) ; outputs head-major bf16 ql/kl/v and D-major u.
# --------------------------------------------------------------------------------------
def _qkvu_lrpe_kernel(x_ref, w_ref, theta_ref, ql_ref, kl_ref, v_ref, u_ref, *, n_head):
    r = pl.program_id(1)
    tr = x_ref.shape[1]
    d = x_ref.shape[2]
    e = d // n_head

    x = x_ref[0].astype(jnp.float32)                         # (tr, D)
    xn = _srms(x)
    qkvu = jnp.dot(xn.astype(jnp.bfloat16), w_ref[...],
                   preferred_element_type=jnp.float32)       # (tr, 4D)
    q = _silu(qkvu[:, 0 * d:1 * d])
    k = _silu(qkvu[:, 1 * d:2 * d])
    v = qkvu[:, 2 * d:3 * d]
    u = qkvu[:, 3 * d:4 * d]
    u_ref[0] = u.astype(u_ref.dtype)

    # Lrpe angles in f32 (positions are globally known: r*tr + row).
    pos = (r * tr + lax.broadcasted_iota(jnp.int32, (tr, e), 0)).astype(jnp.float32)
    for h in range(n_head):
        ang = pos * theta_ref[h]                             # (tr, E)
        c = jnp.cos(ang)
        s = jnp.sin(ang)
        qh = q[:, h * e:(h + 1) * e]
        kh = k[:, h * e:(h + 1) * e]
        ql_ref[0, h] = jnp.concatenate([qh * c, qh * s], axis=-1).astype(ql_ref.dtype)
        kl_ref[0, h] = jnp.concatenate([kh * c, kh * s], axis=-1).astype(kl_ref.dtype)
        v_ref[0, h] = v[:, h * e:(h + 1) * e].astype(v_ref.dtype)


# --------------------------------------------------------------------------------------
# Pass 2: chunked-recurrent causal linear attention + u-gate + out_proj + residual +
#         SGLU + residual.  Per-head f32 state S (2E, E) is carried across chunks.
# --------------------------------------------------------------------------------------
def _attn_epilogue_kernel(x_ref, ql_ref, kl_ref, v_ref, u_ref,
                          wout_ref, wl12_ref, wl3_ref, o_ref,
                          s_ref, att_ref, *, n_head):
    ci = pl.program_id(1)
    nc = pl.num_programs(1)
    tc = x_ref.shape[1]
    d = x_ref.shape[2]
    e = d // n_head

    @pl.when(ci == 0)
    def _init():
        s_ref[...] = jnp.zeros_like(s_ref)

    ql = ql_ref[0]                                           # (H, tc, 2E) bf16
    kl = kl_ref[0]                                           # (H, tc, 2E) bf16
    v = v_ref[0]                                             # (H, tc, E)  bf16

    # Inter-chunk contribution: Q_i @ S, with S = sum_{j<i} K_j^T V_j (f32 state).
    inter = jnp.einsum('hqe,hef->hqf', ql, s_ref[...].astype(jnp.bfloat16),
                       preferred_element_type=jnp.float32)   # (H, tc, E)

    # Intra-chunk causal contribution — single 2E-deep contraction, mask only here.
    energy = jnp.einsum('hqe,hke->hqk', ql, kl,
                        preferred_element_type=jnp.float32)  # (H, tc, tc)
    row = lax.broadcasted_iota(jnp.int32, (tc, tc), 0)
    col = lax.broadcasted_iota(jnp.int32, (tc, tc), 1)
    energy = jnp.where((col <= row)[None, :, :], energy, 0.0)
    intra = jnp.einsum('hqk,hke->hqe', energy.astype(jnp.bfloat16), v,
                       preferred_element_type=jnp.float32)   # (H, tc, E)

    # Merge heads into (tc, D).
    for h in range(n_head):
        att_ref[:, h * e:(h + 1) * e] = inter[h] + intra[h]

    # State update for the next chunk (skipped on the last chunk of each batch).
    @pl.when(ci < nc - 1)
    def _update():
        for h in range(n_head):
            s_ref[h] = s_ref[h] + jnp.dot(kl[h].T, v[h],
                                          preferred_element_type=jnp.float32)

    att = _srms(att_ref[...])                                # (tc, D)
    att = u_ref[0].astype(jnp.float32) * att
    out = jnp.dot(att.astype(jnp.bfloat16), wout_ref[...],
                  preferred_element_type=jnp.float32)
    x1 = x_ref[0].astype(jnp.float32) + out                  # residual 1

    xn2 = _srms(x1).astype(jnp.bfloat16)
    o12 = jnp.dot(xn2, wl12_ref[...], preferred_element_type=jnp.float32)   # (tc, 4D)
    gate = (o12[:, :2 * d] * o12[:, 2 * d:]).astype(jnp.bfloat16)
    ff = jnp.dot(gate, wl3_ref[...], preferred_element_type=jnp.float32)
    o_ref[0] = (x1 + ff).astype(o_ref.dtype)                 # residual 2


def transnormer_block(x, wqkvu, wout, wl1, wl2, wl3, theta, *, n_head,
                      tc=None, tr=None):
    B, N, D = x.shape
    assert D % n_head == 0
    E = D // n_head

    vmem_lim = _vmem_limit_bytes()
    tc = _pick_tile(N, D, n_head, vmem_lim, tc)
    tr = _pick_tile(N, D, n_head, vmem_lim, tr)

    bf16 = jnp.bfloat16
    wqkvu_b = wqkvu.astype(bf16)
    wout_b = wout.astype(bf16)
    wl12_b = jnp.concatenate([wl1, wl2], axis=-1).astype(bf16)   # fused (D, 4D)
    wl3_b = wl3.astype(bf16)
    theta_f = theta.astype(jnp.float32)                          # (H, 1, E)

    # single-buffered constant-index weights when supported (halves resident footprint)
    wkw = ({"pipeline_mode": pl.Buffered(1)}
           if _single_buffer_weights_supported() else {})

    # ------------------------------ pass 1: projections + Lrpe ------------------------
    cost1 = pl.CostEstimate(
        flops=2 * B * N * D * 4 * D,
        transcendentals=4 * B * N * D,
        bytes_accessed=(x.dtype.itemsize * B * N * D + 2 * D * 4 * D
                        + 2 * (2 * B * N * 2 * D)      # ql + kl (bf16)
                        + 2 * (2 * B * N * D)))        # v + u (bf16)
    ql, kl, vh, u = pl.pallas_call(
        functools.partial(_qkvu_lrpe_kernel, n_head=n_head),
        out_shape=(
            jax.ShapeDtypeStruct((B, n_head, N, 2 * E), bf16),   # lrpe(silu(q))
            jax.ShapeDtypeStruct((B, n_head, N, 2 * E), bf16),   # lrpe(silu(k))
            jax.ShapeDtypeStruct((B, n_head, N, E), bf16),       # v
            jax.ShapeDtypeStruct((B, N, D), bf16),               # u (gate)
        ),
        grid_spec=pltpu.PrefetchScalarGridSpec(
            num_scalar_prefetch=0,
            grid=(B, N // tr),
            in_specs=[
                pl.BlockSpec((1, tr, D), lambda b, r: (b, r, 0)),
                pl.BlockSpec((D, 4 * D), lambda b, r: (0, 0), **wkw),
                pl.BlockSpec((n_head, 1, E), lambda b, r: (0, 0, 0)),
            ],
            out_specs=(
                pl.BlockSpec((1, n_head, tr, 2 * E), lambda b, r: (b, 0, r, 0)),
                pl.BlockSpec((1, n_head, tr, 2 * E), lambda b, r: (b, 0, r, 0)),
                pl.BlockSpec((1, n_head, tr, E), lambda b, r: (b, 0, r, 0)),
                pl.BlockSpec((1, tr, D), lambda b, r: (b, r, 0)),
            ),
        ),
        compiler_params=pltpu.CompilerParams(
            dimension_semantics=("parallel", "parallel"),
            vmem_limit_bytes=vmem_lim),
        cost_estimate=cost1,
    )(x, wqkvu_b, theta_f)

    # --------------------- pass 2: chunked recurrence + gate + SGLU -------------------
    attn_flops = B * N * (8 * E * D + 6 * tc * D)
    proj_flops = 2 * B * N * D * (D + 4 * D + 2 * D)
    cost2 = pl.CostEstimate(
        flops=attn_flops + proj_flops,
        transcendentals=4 * B * N,
        bytes_accessed=(x.dtype.itemsize * B * N * D            # x in
                        + 2 * (2 * B * N * 2 * D)               # ql + kl (read once)
                        + 2 * (2 * B * N * D)                   # v + u
                        + x.dtype.itemsize * B * N * D          # y out
                        + 2 * (D * D + 4 * D * D + 2 * D * D))) # weights (bf16)
    out = pl.pallas_call(
        functools.partial(_attn_epilogue_kernel, n_head=n_head),
        out_shape=jax.ShapeDtypeStruct((B, N, D), x.dtype),
        grid_spec=pltpu.PrefetchScalarGridSpec(
            num_scalar_prefetch=0,
            grid=(B, N // tc),
            in_specs=[
                pl.BlockSpec((1, tc, D), lambda b, i: (b, i, 0)),                   # x
                pl.BlockSpec((1, n_head, tc, 2 * E), lambda b, i: (b, 0, i, 0)),    # ql
                pl.BlockSpec((1, n_head, tc, 2 * E), lambda b, i: (b, 0, i, 0)),    # kl
                pl.BlockSpec((1, n_head, tc, E), lambda b, i: (b, 0, i, 0)),        # v
                pl.BlockSpec((1, tc, D), lambda b, i: (b, i, 0)),                   # u
                pl.BlockSpec((D, D), lambda b, i: (0, 0), **wkw),                   # W_out
                pl.BlockSpec((D, 4 * D), lambda b, i: (0, 0), **wkw),               # W_l1|l2
                pl.BlockSpec((2 * D, D), lambda b, i: (0, 0), **wkw),               # W_l3
            ],
            out_specs=pl.BlockSpec((1, tc, D), lambda b, i: (b, i, 0)),
            scratch_shapes=[
                pltpu.VMEM((n_head, 2 * E, E), jnp.float32),    # per-head KV state
                pltpu.VMEM((tc, D), jnp.float32),               # merged-heads buffer
            ],
        ),
        compiler_params=pltpu.CompilerParams(
            # batch axis parallel (megacore); chunk axis is a true recurrence.
            dimension_semantics=("parallel", "arbitrary"),
            vmem_limit_bytes=vmem_lim),
        cost_estimate=cost2,
    )(x, ql, kl, vh, u, wout_b, wl12_b, wl3_b)
    return out


def block_ref(x, wqkvu, wout, wl1, wl2, wl3, theta, *, n_head):
    """Pure-JAX f32 reference mirroring the PyTorch Block.forward (training path)."""
    B, N, D = x.shape
    E = D // n_head
    resid = x
    xn = _srms(x)
    qkvu = xn @ wqkvu
    q, k, v, u = jnp.split(qkvu, 4, axis=-1)
    to_heads = lambda t: t.reshape(B, N, n_head, E).transpose(0, 2, 1, 3)
    q, k, v = map(to_heads, (q, k, v))
    q, k = _silu(q), _silu(k)
    index = jnp.arange(N, dtype=x.dtype).reshape(1, N, 1)
    ang = theta * index                                             # (H, N, E)
    lrpe = lambda t: jnp.concatenate([t * jnp.cos(ang), t * jnp.sin(ang)], axis=-1)
    q, k = lrpe(q), lrpe(k)
    mask = jnp.tril(jnp.ones((N, N), x.dtype))
    energy = jnp.einsum('bhnd,bhmd->bhnm', q, k) * mask
    out = jnp.einsum('bhnm,bhme->bhne', energy, v)
    out = out.transpose(0, 2, 1, 3).reshape(B, N, D)
    out = u * _srms(out)
    x1 = resid + out @ wout
    xn2 = _srms(x1)
    return x1 + ((xn2 @ wl1) * (xn2 @ wl2)) @ wl3


if __name__ == "__main__":
    # Small config: n_embd=64, n_head=2 (head_dim=32), batch=2, seq=16, bias=False.
    # Chunk size 8 -> 2 chunks per sequence, exercising the carried KV state and the
    # chunk-0 state reset.
    B, N, D, H = 2, 16, 64, 2
    E = D // H

    key = jax.random.PRNGKey(0)
    kx, k1, k2, k3, k4, k5 = jax.random.split(key, 6)

    def init_linear(k, fan_in, fan_out):
        bound = 1.0 / np.sqrt(fan_in)
        return jax.random.uniform(k, (fan_in, fan_out), jnp.float32, -bound, bound)

    x      = jax.random.normal(kx, (B, N, D), jnp.float32)
    wqkvu  = init_linear(k1, D, 4 * D)
    wout   = init_linear(k2, D, D)
    wl1    = init_linear(k3, D, 2 * D)
    wl2    = init_linear(k4, D, 2 * D)
    wl3    = init_linear(k5, 2 * D, D)
    # Lrpe theta: 10000 ** (-2/d * arange(d)).reshape(h, 1, e)
    theta  = (10000.0 ** (-2.0 / D * jnp.arange(D, dtype=jnp.float32))).reshape(H, 1, E)

    out = transnormer_block(x, wqkvu, wout, wl1, wl2, wl3, theta,
                            n_head=H, tc=8, tr=8)
    out = jax.block_until_ready(out)

    ref = block_ref(x, wqkvu, wout, wl1, wl2, wl3, theta, n_head=H)
    # bf16 MXU operands with f32 accumulation / f32 KV state -> bf16-level tolerance.
    np.testing.assert_allclose(np.asarray(out), np.asarray(ref), rtol=5e-2, atol=5e-2)

    print("KERNEL_OK")
</pallas_src>

<mosaic_0001>
module attributes {stable_mosaic.version = 11 : i64} {
  func.func @_copy(%arg0: i32, %arg1: memref<8x128xf32, #tpu.memory_space<vmem>>, %arg2: memref<8x128xf32, #tpu.memory_space<vmem>>, %arg3: memref<8x128xf32, #tpu.memory_space<vmem>>) attributes {dimension_semantics = [#tpu.dimension_semantics<arbitrary>], iteration_bounds = array<i64: 4>, scalar_prefetch = 0 : i64, scratch_operands = 0 : i64, tpu.core_type = #tpu.core_type<tc>, window_params = [{transform_indices = @transform_0, window_bounds = array<i64: 8, 128>}, {pipeline_mode = #tpu.pipeline_mode<synchronous>, transform_indices = @transform_1, window_bounds = array<i64: 8, 128>}, {transform_indices = @transform_2, window_bounds = array<i64: 8, 128>}]} {
    %c0 = arith.constant 0 : index
    %c0_0 = arith.constant 0 : index
    %0 = vector.load %arg1[%c0, %c0_0] : memref<8x128xf32, #tpu.memory_space<vmem>>, vector<8x128xf32>
    %c0_1 = arith.constant 0 : index
    %c0_2 = arith.constant 0 : index
    %1 = vector.load %arg2[%c0_1, %c0_2] : memref<8x128xf32, #tpu.memory_space<vmem>>, vector<8x128xf32>
    %2 = arith.addf %0, %1 : vector<8x128xf32>
    %c0_3 = arith.constant 0 : index
    %c0_4 = arith.constant 0 : index
    %3 = vector.load %arg3[%c0_3, %c0_4] : memref<8x128xf32, #tpu.memory_space<vmem>>, vector<8x128xf32>
    tpu.vector_store %arg3[%c0_3, %c0_4], %2 {strides = array<i32>} : memref<8x128xf32, #tpu.memory_space<vmem>>, vector<8x128xf32>,
    return
  }
  func.func @transform_0(%arg0: i32) -> (i32, i32) {
    %c0_i32 = arith.constant 0 : i32
    %c0_i32_0 = arith.constant 0 : i32
    return %arg0, %c0_i32 : i32, i32
  }
  func.func @transform_1(%arg0: i32) -> (i32, i32) {
    %c0_i32 = arith.constant 0 : i32
    %c0_i32_0 = arith.constant 0 : i32
    %c0_i32_1 = arith.constant 0 : i32
    return %c0_i32, %c0_i32_0 : i32, i32
  }
  func.func @transform_2(%arg0: i32) -> (i32, i32) {
    %c0_i32 = arith.constant 0 : i32
    %c0_i32_0 = arith.constant 0 : i32
    return %arg0, %c0_i32 : i32, i32
  }
}

module attributes {stable_mosaic.version = 11 : i64} {
  func.func @_qkvu_lrpe_kernel(%arg0: i32, %arg1: i32, %arg2: memref<1x8x64xf32, #tpu.memory_space<vmem>>, %arg3: memref<64x256xbf16, #tpu.memory_space<vmem>>, %arg4: memref<2x1x32xf32, #tpu.memory_space<vmem>>, %arg5: memref<1x2x8x64xbf16, #tpu.memory_space<vmem>>, %arg6: memref<1x2x8x64xbf16, #tpu.memory_space<vmem>>, %arg7: memref<1x2x8x32xbf16, #tpu.memory_space<vmem>>, %arg8: memref<1x8x64xbf16, #tpu.memory_space<vmem>>) attributes {dimension_semantics = [#tpu.dimension_semantics<parallel>, #tpu.dimension_semantics<parallel>], iteration_bounds = array<i64: 2, 2>, scalar_prefetch = 0 : i64, scratch_operands = 0 : i64, tpu.core_type = #tpu.core_type<tc>, window_params = [{transform_indices = @transform_0, window_bounds = array<i64: 1, 8, 64>}, {pipeline_mode = #tpu.pipeline_mode<synchronous>, transform_indices = @transform_1, window_bounds = array<i64: 64, 256>}, {pipeline_mode = #tpu.pipeline_mode<synchronous>, transform_indices = @transform_2, window_bounds = array<i64: 2, 1, 32>}, {transform_indices = @transform_3, window_bounds = array<i64: 1, 2, 8, 64>}, {transform_indices = @transform_4, window_bounds = array<i64: 1, 2, 8, 64>}, {transform_indices = @transform_5, window_bounds = array<i64: 1, 2, 8, 32>}, {transform_indices = @transform_6, window_bounds = array<i64: 1, 8, 64>}]} {
    %c0 = arith.constant 0 : index
    %c0_0 = arith.constant 0 : index
    %c0_1 = arith.constant 0 : index
    %0 = vector.load %arg2[%c0, %c0_0, %c0_1] : memref<1x8x64xf32, #tpu.memory_space<vmem>>, vector<1x8x64xf32>
    %1 = vector.shape_cast %0 : vector<1x8x64xf32> to vector<8x64xf32>
    %2 = arith.mulf %1, %1 : vector<8x64xf32>
    %cst = arith.constant dense<0.000000e+00> : vector<8xf32>
    %3 = vector.multi_reduction <add>, %2, %cst [1] : vector<8x64xf32> to vector<8xf32>
    %4 = vector.shape_cast %3 : vector<8xf32> to vector<8x1xf32>
    %cst_2 = arith.constant 6.400000e+01 : f32
    %5 = vector.broadcast %cst_2 : f32 to vector<8x1xf32>
    %6 = arith.divf %4, %5 : vector<8x1xf32>
    %cst_3 = arith.constant 9.99999997E-7 : f32
    %7 = vector.broadcast %cst_3 : f32 to vector<8x1xf32>
    %8 = arith.addf %6, %7 : vector<8x1xf32>
    %9 = math.rsqrt %8 : vector<8x1xf32>
    %10 = vector.broadcast %9 : vector<8x1xf32> to vector<8x64xf32>
    %11 = arith.mulf %1, %10 : vector<8x64xf32>
    %12 = arith.truncf %11 : vector<8x64xf32> to vector<8x64xbf16>
    %c0_4 = arith.constant 0 : index
    %c0_5 = arith.constant 0 : index
    %13 = vector.load %arg3[%c0_4, %c0_5] : memref<64x256xbf16, #tpu.memory_space<vmem>>, vector<64x256xbf16>
    %cst_6 = arith.constant dense<0.000000e+00> : vector<8x256xf32>
    %14 = tpu.matmul %12, %13, %cst_6 {dimension_numbers = #tpu.dot_dimension_numbers<[1], [0], [0], [1], [0, 0, 1, 1], [], []>} : vector<8x64xbf16>, vector<64x256xbf16>, vector<8x256xf32> -> vector<8x256xf32>
    %15 = vector.extract_strided_slice %14 {offsets = [0, 0], sizes = [8, 64], strides = [1, 1]} : vector<8x256xf32> to vector<8x64xf32>
    %16 = arith.negf %15 : vector<8x64xf32>
    %17 = math.exp %16 : vector<8x64xf32>
    %cst_7 = arith.constant 1.000000e+00 : f32
    %18 = vector.broadcast %cst_7 : f32 to vector<8x64xf32>
    %19 = arith.addf %18, %17 : vector<8x64xf32>
    %20 = arith.divf %18, %19 : vector<8x64xf32>
    %21 = arith.mulf %15, %20 : vector<8x64xf32>
    %22 = vector.extract_strided_slice %14 {offsets = [0, 64], sizes = [8, 64], strides = [1, 1]} : vector<8x256xf32> to vector<8x64xf32>
    %23 = arith.negf %22 : vector<8x64xf32>
    %24 = math.exp %23 : vector<8x64xf32>
    %cst_8 = arith.constant 1.000000e+00 : f32
    %25 = vector.broadcast %cst_8 : f32 to vector<8x64xf32>
    %26 = arith.addf %25, %24 : vector<8x64xf32>
    %27 = arith.divf %25, %26 : vector<8x64xf32>
    %28 = arith.mulf %22, %27 : vector<8x64xf32>
    %29 = vector.extract_strided_slice %14 {offsets = [0, 128], sizes = [8, 64], strides = [1, 1]} : vector<8x256xf32> to vector<8x64xf32>
    %30 = vector.extract_strided_slice %14 {offsets = [0, 192], sizes = [8, 64], strides = [1, 1]} : vector<8x256xf32> to vector<8x64xf32>
    %31 = arith.truncf %30 : vector<8x64xf32> to vector<8x64xbf16>
    %c0_9 = arith.constant 0 : index
    %c0_10 = arith.constant 0 : index
    %c0_11 = arith.constant 0 : index
    %32 = vector.load %arg8[%c0_9, %c0_10, %c0_11] : memref<1x8x64xbf16, #tpu.memory_space<vmem>>, vector<1x8x64xbf16>
    %33 = vector.shape_cast %32 : vector<1x8x64xbf16> to vector<8x64xbf16>
    %34 = vector.shape_cast %31 : vector<8x64xbf16> to vector<1x8x64xbf16>
    tpu.vector_store %arg8[%c0_9, %c0_10, %c0_11], %34 {strides = array<i32>} : memref<1x8x64xbf16, #tpu.memory_space<vmem>>, vector<1x8x64xbf16>,
    %c8_i32 = arith.constant 8 : i32
    %35 = arith.muli %arg1, %c8_i32 : i32
    %36 = tpu.iota {dimensions = array<i32: 0>} : vector<8x32xi32>
    %37 = vector.broadcast %35 : i32 to vector<8x32xi32>
    %38 = arith.addi %37, %36 : vector<8x32xi32>
    %39 = arith.sitofp %38 : vector<8x32xi32> to vector<8x32xf32>
    %c0_12 = arith.constant 0 : index
    %c0_13 = arith.constant 0 : index
    %c0_14 = arith.constant 0 : index
    %40 = vector.load %arg4[%c0_12, %c0_13, %c0_14] : memref<2x1x32xf32, #tpu.memory_space<vmem>>, vector<1x1x32xf32>
    %41 = vector.shape_cast %40 : vector<1x1x32xf32> to vector<1x32xf32>
    %42 = vector.broadcast %41 : vector<1x32xf32> to vector<8x32xf32>
    %43 = arith.mulf %39, %42 : vector<8x32xf32>
    %44 = math.cos %43 : vector<8x32xf32>
    %45 = math.sin %43 : vector<8x32xf32>
    %46 = vector.extract_strided_slice %21 {offsets = [0, 0], sizes = [8, 32], strides = [1, 1]} : vector<8x64xf32> to vector<8x32xf32>
    %47 = vector.extract_strided_slice %28 {offsets = [0, 0], sizes = [8, 32], strides = [1, 1]} : vector<8x64xf32> to vector<8x32xf32>
    %48 = arith.mulf %46, %44 : vector<8x32xf32>
    %49 = arith.mulf %46, %45 : vector<8x32xf32>
    %50 = tpu.concatenate %48, %49 in 1 : vector<8x32xf32>, vector<8x32xf32> -> vector<8x64xf32>
    %51 = arith.truncf %50 : vector<8x64xf32> to vector<8x64xbf16>
    %c0_15 = arith.constant 0 : index
    %c0_16 = arith.constant 0 : index
    %c0_17 = arith.constant 0 : index
    %c0_18 = arith.constant 0 : index
    %52 = vector.load %arg5[%c0_15, %c0_16, %c0_17, %c0_18] : memref<1x2x8x64xbf16, #tpu.memory_space<vmem>>, vector<1x1x8x64xbf16>
    %53 = vector.shape_cast %52 : vector<1x1x8x64xbf16> to vector<8x64xbf16>
    %54 = vector.shape_cast %51 : vector<8x64xbf16> to vector<1x1x8x64xbf16>
    tpu.vector_store %arg5[%c0_15, %c0_16, %c0_17, %c0_18], %54 {strides = array<i32>} : memref<1x2x8x64xbf16, #tpu.memory_space<vmem>>, vector<1x1x8x64xbf16>,
    %55 = arith.mulf %47, %44 : vector<8x32xf32>
    %56 = arith.mulf %47, %45 : vector<8x32xf32>
    %57 = tpu.concatenate %55, %56 in 1 : vector<8x32xf32>, vector<8x32xf32> -> vector<8x64xf32>
    %58 = arith.truncf %57 : vector<8x64xf32> to vector<8x64xbf16>
    %c0_19 = arith.constant 0 : index
    %c0_20 = arith.constant 0 : index
    %c0_21 = arith.constant 0 : index
    %c0_22 = arith.constant 0 : index
    %59 = vector.load %arg6[%c0_19, %c0_20, %c0_21, %c0_22] : memref<1x2x8x64xbf16, #tpu.memory_space<vmem>>, vector<1x1x8x64xbf16>
    %60 = vector.shape_cast %59 : vector<1x1x8x64xbf16> to vector<8x64xbf16>
    %61 = vector.shape_cast %58 : vector<8x64xbf16> to vector<1x1x8x64xbf16>
    tpu.vector_store %arg6[%c0_19, %c0_20, %c0_21, %c0_22], %61 {strides = array<i32>} : memref<1x2x8x64xbf16, #tpu.memory_space<vmem>>, vector<1x1x8x64xbf16>,
    %62 = vector.extract_strided_slice %29 {offsets = [0, 0], sizes = [8, 32], strides = [1, 1]} : vector<8x64xf32> to vector<8x32xf32>
    %63 = arith.truncf %62 : vector<8x32xf32> to vector<8x32xbf16>
    %c0_23 = arith.constant 0 : index
    %c0_24 = arith.constant 0 : index
    %c0_25 = arith.constant 0 : index
    %c0_26 = arith.constant 0 : index
    %64 = vector.load %arg7[%c0_23, %c0_24, %c0_25, %c0_26] : memref<1x2x8x32xbf16, #tpu.memory_space<vmem>>, vector<1x1x8x32xbf16>
    %65 = vector.shape_cast %64 : vector<1x1x8x32xbf16> to vector<8x32xbf16>
    %66 = vector.shape_cast %63 : vector<8x32xbf16> to vector<1x1x8x32xbf16>
    tpu.vector_store %arg7[%c0_23, %c0_24, %c0_25, %c0_26], %66 {strides = array<i32>} : memref<1x2x8x32xbf16, #tpu.memory_space<vmem>>, vector<1x1x8x32xbf16>,
    %c1 = arith.constant 1 : index
    %c0_27 = arith.constant 0 : index
    %c0_28 = arith.constant 0 : index
    %67 = vector.load %arg4[%c1, %c0_27, %c0_28] : memref<2x1x32xf32, #tpu.memory_space<vmem>>, vector<1x1x32xf32>
    %68 = vector.shape_cast %67 : vector<1x1x32xf32> to vector<1x32xf32>
    %69 = vector.broadcast %68 : vector<1x32xf32> to vector<8x32xf32>
    %70 = arith.mulf %39, %69 : vector<8x32xf32>
    %71 = math.cos %70 : vector<8x32xf32>
    %72 = math.sin %70 : vector<8x32xf32>
    %73 = vector.extract_strided_slice %21 {offsets = [0, 32], sizes = [8, 32], strides = [1, 1]} : vector<8x64xf32> to vector<8x32xf32>
    %74 = vector.extract_strided_slice %28 {offsets = [0, 32], sizes = [8, 32], strides = [1, 1]} : vector<8x64xf32> to vector<8x32xf32>
    %75 = arith.mulf %73, %71 : vector<8x32xf32>
    %76 = arith.mulf %73, %72 : vector<8x32xf32>
    %77 = tpu.concatenate %75, %76 in 1 : vector<8x32xf32>, vector<8x32xf32> -> vector<8x64xf32>
    %78 = arith.truncf %77 : vector<8x64xf32> to vector<8x64xbf16>
    %c0_29 = arith.constant 0 : index
    %c1_30 = arith.constant 1 : index
    %c0_31 = arith.constant 0 : index
    %c0_32 = arith.constant 0 : index
    %79 = vector.load %arg5[%c0_29, %c1_30, %c0_31, %c0_32] : memref<1x2x8x64xbf16, #tpu.memory_space<vmem>>, vector<1x1x8x64xbf16>
    %80 = vector.shape_cast %79 : vector<1x1x8x64xbf16> to vector<8x64xbf16>
    %81 = vector.shape_cast %78 : vector<8x64xbf16> to vector<1x1x8x64xbf16>
    tpu.vector_store %arg5[%c0_29, %c1_30, %c0_31, %c0_32], %81 {strides = array<i32>} : memref<1x2x8x64xbf16, #tpu.memory_space<vmem>>, vector<1x1x8x64xbf16>,
    %82 = arith.mulf %74, %71 : vector<8x32xf32>
    %83 = arith.mulf %74, %72 : vector<8x32xf32>
    %84 = tpu.concatenate %82, %83 in 1 : vector<8x32xf32>, vector<8x32xf32> -> vector<8x64xf32>
    %85 = arith.truncf %84 : vector<8x64xf32> to vector<8x64xbf16>
    %c0_33 = arith.constant 0 : index
    %c1_34 = arith.constant 1 : index
    %c0_35 = arith.constant 0 : index
    %c0_36 = arith.constant 0 : index
    %86 = vector.load %arg6[%c0_33, %c1_34, %c0_35, %c0_36] : memref<1x2x8x64xbf16, #tpu.memory_space<vmem>>, vector<1x1x8x64xbf16>
    %87 = vector.shape_cast %86 : vector<1x1x8x64xbf16> to vector<8x64xbf16>
    %88 = vector.shape_cast %85 : vector<8x64xbf16> to vector<1x1x8x64xbf16>
    tpu.vector_store %arg6[%c0_33, %c1_34, %c0_35, %c0_36], %88 {strides = array<i32>} : memref<1x2x8x64xbf16, #tpu.memory_space<vmem>>, vector<1x1x8x64xbf16>,
    %89 = vector.extract_strided_slice %29 {offsets = [0, 32], sizes = [8, 32], strides = [1, 1]} : vector<8x64xf32> to vector<8x32xf32>
    %90 = arith.truncf %89 : vector<8x32xf32> to vector<8x32xbf16>
    %c0_37 = arith.constant 0 : index
    %c1_38 = arith.constant 1 : index
    %c0_39 = arith.constant 0 : index
    %c0_40 = arith.constant 0 : index
    %91 = vector.load %arg7[%c0_37, %c1_38, %c0_39, %c0_40] : memref<1x2x8x32xbf16, #tpu.memory_space<vmem>>, vector<1x1x8x32xbf16>
    %92 = vector.shape_cast %91 : vector<1x1x8x32xbf16> to vector<8x32xbf16>
    %93 = vector.shape_cast %90 : vector<8x32xbf16> to vector<1x1x8x32xbf16>
    tpu.vector_store %arg7[%c0_37, %c1_38, %c0_39, %c0_40], %93 {strides = array<i32>} : memref<1x2x8x32xbf16, #tpu.memory_space<vmem>>, vector<1x1x8x32xbf16>,
    return
  }
  func.func @transform_0(%arg0: i32, %arg1: i32) -> (i32, i32, i32) {
    %c0_i32 = arith.constant 0 : i32
    %c0_i32_0 = arith.constant 0 : i32
    return %arg0, %arg1, %c0_i32 : i32, i32, i32
  }
  func.func @transform_1(%arg0: i32, %arg1: i32) -> (i32, i32) {
    %c0_i32 = arith.constant 0 : i32
    %c0_i32_0 = arith.constant 0 : i32
    %c0_i32_1 = arith.constant 0 : i32
    return %c0_i32, %c0_i32_0 : i32, i32
  }
  func.func @transform_2(%arg0: i32, %arg1: i32) -> (i32, i32, i32) {
    %c0_i32 = arith.constant 0 : i32
    %c0_i32_0 = arith.constant 0 : i32
    %c0_i32_1 = arith.constant 0 : i32
    %c0_i32_2 = arith.constant 0 : i32
    return %c0_i32, %c0_i32_0, %c0_i32_1 : i32, i32, i32
  }
  func.func @transform_3(%arg0: i32, %arg1: i32) -> (i32, i32, i32, i32) {
    %c0_i32 = arith.constant 0 : i32
    %c0_i32_0 = arith.constant 0 : i32
    %c0_i32_1 = arith.constant 0 : i32
    return %arg0, %c0_i32, %arg1, %c0_i32_0 : i32, i32, i32, i32
  }
  func.func @transform_4(%arg0: i32, %arg1: i32) -> (i32, i32, i32, i32) {
    %c0_i32 = arith.constant 0 : i32
    %c0_i32_0 = arith.constant 0 : i32
    %c0_i32_1 = arith.constant 0 : i32
    return %arg0, %c0_i32, %arg1, %c0_i32_0 : i32, i32, i32, i32
  }
  func.func @transform_5(%arg0: i32, %arg1: i32) -> (i32, i32, i32, i32) {
    %c0_i32 = arith.constant 0 : i32
    %c0_i32_0 = arith.constant 0 : i32
    %c0_i32_1 = arith.constant 0 : i32
    return %arg0, %c0_i32, %arg1, %c0_i32_0 : i32, i32, i32, i32
  }
  func.func @transform_6(%arg0: i32, %arg1: i32) -> (i32, i32, i32) {
    %c0_i32 = arith.constant 0 : i32
    %c0_i32_0 = arith.constant 0 : i32
    return %arg0, %arg1, %c0_i32 : i32, i32, i32
  }
}

</mosaic_0001>

<bundles_post_ra>
// kernel: tpu_custom_call.1
= control target key start
LH: loop header
LB: loop body
LE: loop exit
PB: predicated region body
PF: predicated region fallthrough
CT: control target
= control target key end

     0   :  { %7 = vsyncpa [#allocation3], 0  ;;  %s688_s0 = inlined_call_operand.hbm [shape: f32[32,128], index: 0, kind: input, shape index: {}]   ;;  %s689_s1 = inlined_call_operand.hbm [shape: f32[8,128], index: 1, kind: input, shape index: {}]   ;;  %s690_s2 = inlined_call_operand.hbm [shape: f32[32,128], index: 2, kind: output, shape index: {}]  }
   0x1   :  { %9 = vsyncpa [#allocation3 + $0x1], 0 }
   0x2   :  { %10 = vsyncpa [#allocation6], 0 }
   0x3   :  { %11 = vsyncpa [#allocation4], 0 }
   0x4   :  { %13 = vsyncpa [#allocation4 + $0x1], 0  ;;  %s489_s9 = smov 0   ;;  %s491_s10 = smov 0  }
   0x5   :  { %s493_s11 = smov 0   ;;  %s495_s12 = smov 0  }
   0x6 LB: > { %s510_s13 = sadd.s32 4294967295, %s469_s12   ;;  %s270_s14 = sadd.s32 4294967294, %s469_s12   ;;  %s469_s12 = sphi %s495_s12, %s713_s12   ;;  %s465_s11 = sphi %s493_s11, %s712_s11   ;;  %s461_s10 = sphi %s491_s10, %s711_s10   ;;  %s457_s9 = sphi %s489_s9, %s710_s9  }
   0x7   : > { %p39_p0 = scmp.ne.s32.totalorder %s461_s10, %s457_s9  ;;  %p691_p1 = scmp.eq.s32.totalorder %s510_s13, 0 }
   0x8   : > { %p90_p3 = scmp.eq.s32.totalorder %s270_s14, 3  ;;  %p271_p5 = scmp.ge.s32.totalorder %s469_s12, 1 }
   0x9   : > { %p519_p4 = por %p691_p1, %p39_p0  ;;  %p97_p7 = scmp.lt.s32.totalorder %s469_s12, 5 }
   0xa   : > { %p524_p6 = por %p90_p3, %p39_p0  ;;  %s471_s18 = smov [#allocation5]  }
   0xb   : > { %s694_s15 = scalar_select %p519_p4, 1, 0 }
   0xc   : > { %s695_s16 = scalar_select %p524_p6, 1, 0 }
   0xd   : > { %p529_p8 = pnand %p271_p5, %p97_p7  ;;  %s110_s19 = sshll.u32 %s471_s18, 4  ;;  %s111_s19 = int_to_ptr.vmem [resolvable:$true] %s110_s19 }
   0xe   : > { %s536_s20 = sadd.s32 1, %s469_s12   ;;  %s26_s24 = sadd.s32 1, %s465_s11 }
   0xf   : > { %s696_s17 = scalar_select %p529_p8, 1, 0 }
  0x10   : > { %p292_p9 = pneg %p529_p8  ;;  %s23_s22 = ssub.s32 %s469_s12, %s536_s20 }
  0x11   : > { %p546_p11 = scmp.eq.s32.totalorder %s23_s22, 0  ;;  %s341_s27 = scalar_lea.hbm %s689_s1, 128 }
  0x12   : > { %p540_p10 = pnand %p292_p9, %p691_p1  ;;  %p342_p13 = scmp.ne.s32.totalorder %s689_s1, %s341_s27 }
  0x13   : > { %s698_s23 = scalar_select %p546_p11, 1, 0 }
  0x14   : > { %p343_p0 = pneg %p540_p10  ;;  %p348_p7 = scmp.lt.u32.totalorder %s341_s27, %s689_s1 }
  0x16   : > { %p344_p3 = pnand %p343_p0, %p342_p13 }
  0x18   : > { %p345_p5 = pneg %p344_p3 }
  0x1a   : > { %p350_p9 = pnand %p348_p7, %p345_p5 }
  0x1c   : > { %353 = shalt.err (!%p350_p9)
}
  0x1d   : > { %s354_s4 = scalar_lea.vmem %s111_s19, 128  ;;  %p362_p6 = scmp.lt.s32.totalorder %s111_s19, %s111_s19 }
  0x1e   : > { %p355_p1 = scmp.ne.s32.totalorder %s111_s19, %s354_s4  ;;  %p363_p4 = scmp.lt.s32.totalorder %s354_s4, %s354_s4 }
  0x20   : > { %p357_p2 = pnand %p355_p1, %p343_p0  ;;  %p364_p8 = por %p363_p4, %p362_p6 }
  0x22   : > { %p358_p12 = pneg %p357_p2 }
  0x24   : > { %p365_p11 = pnand %p364_p8, %p358_p12 }
  0x26   : > { %368 = shalt.err (!%p365_p11)
}
  0x27   : > { %295 = dma.hbm_to_vmem [thread:$0]  (!%p540_p10), %s689_s1, 128, %s111_s19, [#allocation6]  }
  0x28   : > { %p699_p1 = scmp.ne.s32.totalorder %s698_s23, 0  ;;  %p34_p2 = scmp.eq.s32.totalorder %s469_s12, 0 }
  0x29   : > { %p700_p4 = scmp.ne.s32.totalorder %s465_s11, %s461_s10  ;;  %p701_p6 = scmp.eq.s32.totalorder %s510_s13, 3 }
  0x2a   : > { %s572_s7 = scalar_select %p699_p1, %s465_s11, %s26_s24  }
  0x2b   : > { %p580_p8 = por %p701_p6, %p700_p4  ;;  %p305_p11 = scmp.lt.s32.totalorder %s469_s12, 4 }
  0x2c   : > { %s121_s14 = sand.u32 1, %s465_s11   ;;  %p703_p12 = pmov %p700_p4 }
  0x2d   : > { %s274_s18 = sshll.u32 %s121_s14, 3  ;;  %s275_s21 = sshll.u32 %s469_s12, 7 }
  0x2e   : > { %p35_p13 = por %p34_p2, %p703_p12  ;;  %s593_s19 = scalar_lea.hbm %s688_s0, %s275_s21 }
  0x2f   : > { %s125_s23 = scalar_lea.vmem [#allocation2], %s274_s18  ;;  %s122_s27 = scalar_lea.sflag [#allocation3], %s121_s14 }
  0x30   : > { %s132_s24 = sshll.u32 %s125_s23, 4  ;;  %p595_p10 = pnand %p305_p11, %p35_p13  ;;  %s599_s24 = int_to_ptr.vmem [resolvable:$true] %s132_s24 }
  0x31   : > { %s369_s28 = scalar_lea.hbm %s593_s19, 128  ;;  %s374_s3 = scalar_lea.hbm %s688_s0, 512 }
  0x32   : > { %p370_p0 = scmp.ne.s32.totalorder %s593_s19, %s369_s28  ;;  %p371_p3 = pneg %p595_p10 }
  0x33   : > { %p375_p9 = scmp.lt.u32.totalorder %s593_s19, %s688_s0  ;;  %p376_p1 = scmp.lt.u32.totalorder %s374_s3, %s369_s28 }
  0x34   : > { %p372_p5 = pnand %p371_p3, %p370_p0  ;;  %p378_p4 = scmp.lt.u32.totalorder %s369_s28, %s593_s19 }
  0x35   : > { %p377_p2 = por %p376_p1, %p375_p9 }
  0x36   : > { %p373_p7 = pneg %p372_p5 }
  0x37   : > { %p379_p6 = por %p378_p4, %p377_p2 }
  0x39   : > { %p380_p11 = pnand %p379_p6, %p373_p7 }
  0x3b   : > { %383 = shalt.err (!%p380_p11)
}
  0x3c   : > { %s384_s6 = scalar_lea.vmem %s599_s24, 128  ;;  %s472_s14 = smov [#allocation2]  }
  0x3d   : > { %p385_p12 = scmp.ne.s32.totalorder %s599_s24, %s384_s6  ;;  %s389_s18 = sshll.u32 %s472_s14, 4  ;;  %s390_s18 = int_to_ptr.vmem [resolvable:$false] %s389_s18 }
  0x3e   : > { %s391_s21 = scalar_lea.vmem %s390_s18, 256  ;;  %p392_p5 = scmp.lt.s32.totalorder %s599_s24, %s390_s18 }
  0x3f   : > { %p387_p13 = pnand %p385_p12, %p371_p3  ;;  %p393_p9 = scmp.lt.s32.totalorder %s391_s21, %s384_s6 }
  0x41   : > { %p388_p0 = pneg %p387_p13  ;;  %p394_p1 = por %p393_p9, %p392_p5 }
  0x43   : > { %p395_p2 = pnand %p394_p1, %p388_p0 }
  0x45   : > { %398 = shalt.err (!%p395_p2)
}
  0x46   : > { %299 = dma.hbm_to_vmem [thread:$0]  (!%p595_p10), %s593_s19, 128, %s599_s24, %s122_s27  }
  0x47   : > { %p705_p7 = scmp.ne.s32.totalorder %s696_s17, 0 }
  0x48   : > { %s629_s22 = sand.u32 (!%p705_p7), 1, %s461_s10   ;;  %p706_p3 = scmp.ne.s32.totalorder (!%p705_p7), %s694_s15, 0 }
  0x49   : > { %141 = sbr.rel (%p705_p7) target bundleno = 109 (0x6d), region = 28  ;;  %s277_s25 = sshll.u32 (!%p705_p7), %s629_s22, 3 }
  0x4a   : > { %s144_s23 = scalar_lea.sflag (!%p705_p7), [#allocation3], %s629_s22  ;;  %s147_s28 = scalar_lea.vmem (!%p705_p7), [#allocation2], %s277_s25 }
  0x50   : > { %444 = dma.done.wait (%p706_p3), %s144_s23, 128  }
  0x51   : > { %446 = vsyncadd (%p706_p3), %s144_s23, 4294967168  ;;  %p707_p4 = scmp.eq.s32.totalorder %s510_s13, 0 }
  0x53   : > { %448 = dma.done.wait (%p707_p4), [#allocation6], 128   ;;  %p708_p10 = pmov %p707_p4 }
  0x54   : > { %s171_s17 = scalar_lea.vmem [#allocation7], %s277_s25  ;;  %s281_s24 = sshll.u32 %s510_s13, 7  ;;  %v172_v0 = vld [vmem:[%s147_s28] sm:$0xff]  ;;  %v173_v1 = vld [vmem:[#allocation5] sm:$0xff] }
  0x55   : > { %450 = vsyncadd (%p708_p10), [#allocation6], 4294967168  ;;  %s190_s19 = sshll.u32 %s171_s17, 4  ;;  %v174_v2 = vadd.f32 %v173_v1, %v172_v0  ;;  %s647_s27 = scalar_lea.hbm %s690_s2, %s281_s24  ;;  %s642_s19 = int_to_ptr.vmem [resolvable:$true] %s190_s19 }
  0x56   : > { %s177_s29 = scalar_lea.sflag [#allocation4], %s629_s22  ;;  %s399_s30 = scalar_lea.vmem %s642_s19, 128 }
  0x57   : > { %175 = vst [vmem:[%s171_s17] sm:$0xff] %v174_v2  ;;  %p400_p6 = scmp.ne.s32.totalorder %s642_s19, %s399_s30  ;;  %s473_s13 = smov [#allocation7]  }
  0x58   : > { %s403_s3 = sshll.u32 %s473_s13, 4  ;;  %s404_s3 = int_to_ptr.vmem [resolvable:$false] %s403_s3 }
  0x59   : > { %p401_p11 = pnand %p400_p6, %p580_p8  ;;  %s405_s4 = scalar_lea.vmem %s404_s3, 256 }
  0x5a   : > { %p406_p13 = scmp.lt.s32.totalorder %s642_s19, %s404_s3  ;;  %p407_p0 = scmp.lt.s32.totalorder %s405_s4, %s399_s30 }
  0x5b   : > { %p402_p12 = pneg %p401_p11 }
  0x5c   : > { %p408_p5 = por %p407_p0, %p406_p13 }
  0x5e   : > { %p409_p9 = pnand %p408_p5, %p402_p12 }
  0x60   : > { %412 = shalt.err (!%p409_p9)
}
  0x61   : > { %s413_s5 = scalar_lea.hbm %s647_s27, 128  ;;  %s417_s18 = scalar_lea.hbm %s690_s2, 512 }
  0x62   : > { %p414_p1 = scmp.ne.s32.totalorder %s647_s27, %s413_s5  ;;  %p418_p3 = scmp.lt.u32.totalorder %s647_s27, %s690_s2 }
  0x63   : > { %p419_p4 = scmp.lt.u32.totalorder %s417_s18, %s413_s5  ;;  %p421_p6 = scmp.lt.u32.totalorder %s413_s5, %s647_s27 }
  0x64   : > { %p415_p2 = pnand %p414_p1, %p580_p8 }
  0x65   : > { %p420_p10 = por %p419_p4, %p418_p3 }
  0x66   : > { %p416_p7 = pneg %p415_p2 }
  0x67   : > { %p422_p11 = por %p421_p6, %p420_p10 }
  0x69   : > { %p423_p12 = pnand %p422_p11, %p416_p7 }
  0x6b   : > { %426 = shalt.err (!%p423_p12)
}
  0x6c   : > { %290 = dma.vmem_to_hbm [thread:$0]  (%p580_p8), %s642_s19, 128, %s647_s27, %s177_s29  }
  0x6d PF: > { %p307_p13 = scmp.ge.s32.totalorder %s469_s12, 2  ;;  %s202_s25 = sand.u32 1, %s457_s9  }
  0x6e   : > { %p709_p0 = scmp.ne.s32.totalorder %s695_s16, 0  ;;  %s203_s23 = scalar_lea.sflag [#allocation4], %s202_s25 }
  0x70   : > { %p301_p5 = pnand %p307_p13, %p709_p0 }
  0x72   : > { %452 = dma.done.wait (!%p301_p5), %s203_s23, 128  }
  0x73   : > { %454 = vsyncadd (!%p301_p5), %s203_s23, 4294967168  ;;  %p16_p9 = scmp.ge.s32.totalorder %s536_s20, 6   ;;  %s710_s9 = smov %s461_s10 }
  0x74   : > { %s711_s10 = smov %s465_s11  ;;  %s712_s11 = smov %s572_s7 }
  0x75   : > { %s713_s12 = smov %s536_s20  ;;  %18 = sbr.rel (!%p16_p9) target bundleno = 6 (0x6), region = 77 }
  0x7c   :  { %208 = vsyncpa [#allocation3], 1 }
  0x7d   :  { %210 = vsyncpa [#allocation3 + $0x1], 1 }
  0x7e   :  { %211 = vsyncpa [#allocation6], 1 }
  0x7f   :  { %212 = vsyncpa [#allocation4], 1 }
  0x80   :  { %214 = vsyncpa [#allocation4 + $0x1], 1 }

// kernel: tpu_custom_call.1
= control target key start
LH: loop header
LB: loop body
LE: loop exit
PB: predicated region body
PF: predicated region fallthrough
CT: control target
= control target key end

     0   :  { %s2346_s0 = inlined_call_operand.hbm [shape: f32[2,16,64], index: 0, kind: input, shape index: {}]   ;;  %s2347_s1 = inlined_call_operand.hbm [shape: bf16[64,256], index: 1, kind: input, shape index: {}]   ;;  %s2348_s2 = inlined_call_operand.hbm [shape: f32[2,1,32], index: 2, kind: input, shape index: {}]   ;;  %s2349_s3 = inlined_call_operand.hbm [shape: bf16[2,2,16,64], index: 3, kind: output, shape index: {0}]   ;;  %s2350_s4 = inlined_call_operand.hbm [shape: bf16[2,2,16,64], index: 4, kind: output, shape index: {1}]   ;;  %s2351_s5 = inlined_call_operand.hbm [shape: bf16[2,2,16,32], index: 5, kind: output, shape index: {2}]   ;;  %s2352_s6 = inlined_call_operand.hbm [shape: bf16[2,16,64], index: 6, kind: output, shape index: {3}]  }
   0x1   :  { %2366 = sst [smem:[#allocation24_spill]] %s2346_s0 }
   0x2   :  { %2367 = sst [smem:[#allocation25_spill]] %s2347_s1 }
   0x3   :  { %2368 = sst [smem:[#allocation26_spill]] %s2348_s2 }
   0x4   :  { %2369 = sst [smem:[#allocation27_spill]] %s2349_s3 }
   0x5   :  { %2370 = sst [smem:[#allocation28_spill]] %s2352_s6 }
   0x6   :  { %12 = vsyncpa [#allocation3], 0 }
   0x7   :  { %14 = vsyncpa [#allocation3 + $0x1], 0 }
   0x8   :  { %15 = vsyncpa [#allocation6], 0 }
   0x9   :  { %16 = vsyncpa [#allocation4], 0 }
   0xa   :  { %18 = vsyncpa [#allocation4 + $0x1], 0 }
   0xb   :  { %19 = vsyncpa [#allocation10], 0 }
   0xc   :  { %21 = vsyncpa [#allocation10 + $0x1], 0 }
   0xd   :  { %22 = vsyncpa [#allocation13], 0 }
   0xe   :  { %24 = vsyncpa [#allocation13 + $0x1], 0  ;;  %s1851_s21 = smov 0   ;;  %s1853_s22 = smov 0  }
   0xf   :  { %s1855_s23 = smov 0   ;;  %s1857_s24 = smov 0  }
  0x10   :  { %s1859_s25 = smov 0   ;;  %s1861_s26 = smov 0  }
  0x11   :  { %s1863_s27 = smov 0   ;;  %s1865_s28 = smov 0  }
  0x12 LB: > { %2371 = sst [smem:[#allocation19_spill]] %s1763_s21  ;;  %s1892_s29 = sadd.s32 4294967295, %s1791_s28   ;;  %s1791_s28 = sphi %s1865_s28, %s30_s28   ;;  %s1787_s27 = sphi %s1863_s27, %s2401_s27   ;;  %s1783_s26 = sphi %s1861_s26, %s2406_s26   ;;  %s1779_s25 = sphi %s1859_s25, %s2399_s25   ;;  %s1775_s24 = sphi %s1857_s24, %s2405_s24   ;;  %s1771_s23 = sphi %s1855_s23, %s2404_s23   ;;  %s1767_s22 = sphi %s1853_s22, %s2403_s22   ;;  %s1763_s21 = sphi %s1851_s21, %s2402_s21  }
  0x13   : > { %2372 = sst [smem:[#allocation20_spill]] %s1787_s27  ;;  %s2356_s30 = sadd.s32 4294967294, %s1791_s28  }
  0x14   : > { %p64_p0 = scmp.ne.s32.totalorder %s1767_s22, %s1763_s21  ;;  %p2353_p1 = scmp.eq.s32.totalorder %s1892_s29, 0 }
  0x15   : > { %p138_p2 = scmp.eq.s32.totalorder %s2356_s30, 3  ;;  %p1269_p4 = scmp.ge.s32.totalorder %s1791_s28, 1 }
  0x16   : > { %p1902_p3 = por %p2353_p1, %p64_p0  ;;  %p229_p6 = scmp.lt.s32.totalorder %s1791_s28, 5 }
  0x17   : > { %p1907_p5 = por %p138_p2, %p64_p0  ;;  %s1793_s10 = smov [#allocation5]  }
  0x18   : > { %s2373_s7 = scalar_select %p1902_p3, 1, 0 }
  0x19   : > { %s2374_s8 = scalar_select %p1907_p5, 1, 0 }
  0x1a   : > { %p1912_p7 = pnand %p1269_p4, %p229_p6  ;;  %s241_s11 = sshll.u32 %s1793_s10, 4  ;;  %s242_s11 = int_to_ptr.vmem [resolvable:$true] %s241_s11 }
  0x1b   : > { %2375 = sst [smem:[#allocation21_spill]] %s2374_s8  ;;  %s1794_s13 = smov [#allocation7]  }
  0x1c   : > { %s2376_s9 = scalar_select %p1912_p7, 1, 0 }
  0x1d   : > { %p1358_p8 = pneg %p1912_p7  ;;  %s254_s14 = sshll.u32 %s1794_s13, 4  ;;  %s1924_s14 = int_to_ptr.vmem [resolvable:$true] %s254_s14 }
  0x1e   : > { %s2378_s1 = sld [smem:[#allocation25_spill]] }
  0x1f   : > { %p1920_p9 = pnand %p1358_p8, %p2353_p1 }
  0x21   : > { %p1513_p11 = pneg %p1920_p9 }
  0x24   : > { %s1511_s17 = scalar_lea.hbm %s2378_s1, 1024 }
  0x25   : > { %p1512_p10 = scmp.ne.s32.totalorder %s2378_s1, %s1511_s17  ;;  %p1518_p0 = scmp.lt.u32.totalorder %s1511_s17, %s2378_s1 }
  0x27   : > { %p1514_p12 = pnand %p1513_p11, %p1512_p10 }
  0x29   : > { %p1515_p13 = pneg %p1514_p12 }
  0x2b   : > { %p1520_p2 = pnand %p1518_p0, %p1515_p13 }
  0x2d   : > { %1523 = shalt.err (!%p1520_p2)
}
  0x2e   : > { %s1524_s13 = scalar_lea.vmem %s242_s11, 1024  ;;  %p1532_p1 = scmp.lt.s32.totalorder %s242_s11, %s242_s11 }
  0x2f   : > { %p1525_p4 = scmp.ne.s32.totalorder %s242_s11, %s1524_s13  ;;  %p1533_p5 = scmp.lt.s32.totalorder %s1524_s13, %s1524_s13 }
  0x31   : > { %p1527_p6 = pnand %p1525_p4, %p1513_p11  ;;  %p1534_p3 = por %p1533_p5, %p1532_p1 }
  0x33   : > { %p1528_p8 = pneg %p1527_p6 }
  0x35   : > { %p1535_p7 = pnand %p1534_p3, %p1528_p8 }
  0x37   : > { %1538 = shalt.err (!%p1535_p7)
}
  0x38   : > { %s1795_s15 = smov 128   ;;  %s1796_s16 = smov 8  }
  0x39   : > { %1361 = dma.hbm_to_vmem [thread:$0]  (!%p1920_p9), %s2378_s1, 1024, %s242_s11, [#allocation6], %s1795_s15, %s1795_s15, %s1796_s16  }
  0x3a   : > { %s2379_s2 = sld [smem:[#allocation26_spill]] }
  0x40   : > { %s1539_s10 = scalar_lea.hbm %s2379_s2, 32 }
  0x41   : > { %p1540_p10 = scmp.ne.s32.totalorder %s2379_s2, %s1539_s10  ;;  %p1546_p5 = scmp.lt.u32.totalorder %s1539_s10, %s2379_s2 }
  0x43   : > { %p1542_p1 = pnand %p1540_p10, %p1513_p11 }
  0x45   : > { %p1543_p3 = pneg %p1542_p1 }
  0x47   : > { %p1548_p7 = pnand %p1546_p5, %p1543_p3 }
  0x49   : > { %1551 = shalt.err (!%p1548_p7)
}
  0x4a   : > { %s1552_s11 = scalar_lea.vmem %s1924_s14, 32  ;;  %p1560_p2 = scmp.lt.s32.totalorder %s1924_s14, %s1924_s14 }
  0x4b   : > { %p1553_p12 = scmp.ne.s32.totalorder %s1924_s14, %s1552_s11  ;;  %p1561_p4 = scmp.lt.s32.totalorder %s1552_s11, %s1552_s11 }
  0x4d   : > { %p1555_p13 = pnand %p1553_p12, %p1513_p11  ;;  %p1562_p6 = por %p1561_p4, %p1560_p2 }
  0x4f   : > { %p1556_p0 = pneg %p1555_p13 }
  0x51   : > { %p1563_p8 = pnand %p1562_p6, %p1556_p0 }
  0x53   : > { %1566 = shalt.err (!%p1563_p8)
}
  0x54   : > { %s1797_s21 = smov 16   ;;  %s1798_s30 = smov 1  }
  0x55   : > { %1364 = dma.hbm_to_vmem [thread:$0]  (!%p1920_p9), %s2379_s2, 32, %s1924_s14, [#allocation6], %s1797_s21, %s1797_s21, %s1798_s30  }
  0x56   : > { %p132_p11 = scmp.eq.s32.totalorder %s1892_s29, 3  ;;  %s39_s16 = sadd.s32 1, %s1783_s26 }
  0x57   : > { %p40_p10 = scmp.ge.s32.totalorder %s39_s16, 2  ;;  %s42_s17 = sadd.s32 1, %s1787_s27 }
  0x58   : > { %p58_p1 = scmp.ne.s32.totalorder %s1771_s23, %s1767_s22  ;;  %p59_p3 = scmp.eq.s32.totalorder %s1791_s28, 0 }
  0x59   : > { %s2408_s16 = smov (%p40_p10, %s39_s16), 0  ;;  %s2410_s17 = smov (!%p40_p10, %s42_s17), %s1787_s27 }
  0x5a   : > { %2380 = sst [smem:[#allocation22_spill]] %s2408_s16  ;;  %s47_s18 = ssub.s32 %s1783_s26, %s2408_s16 }
  0x5b   : > { %s51_s12 = sadd.s32 1, %s1771_s23  ;;  %p44_p5 = scmp.ge.s32.totalorder %s2410_s17, 2 }
  0x5c   : > { %p1985_p7 = por %p132_p11, %p58_p1  ;;  %p1989_p9 = por %p59_p3, %p58_p1 }
  0x5d   : > { %s268_s20 = sand.u32 1, %s1771_s23   ;;  %s2412_s17 = smov (%p44_p5, %s2410_s17), 0 }
  0x5e   : > { %2383 = sst [smem:[#allocation23_spill]] %s2412_s17  ;;  %p1384_p12 = scmp.lt.s32.totalorder %s1791_s28, 4 }
  0x5f   : > { %s1273_s10 = sshll.u32 %s268_s20, 3  ;;  %s46_s13 = ssub.s32 %s1787_s27, %s2412_s17 }
  0x60   : > { %s48_s11 = sor.u32 %s47_s18, %s46_s13  ;;  %s1274_s21 = sshll.u32 %s1787_s27, 1 }
  0x61   : > { %p49_p13 = scmp.eq.s32.totalorder %s48_s11, 0  ;;  %s277_s30 = sadd.s32 %s1783_s26, %s1274_s21 }
  0x62   : > { %s1275_s8 = sshll.u32 %s277_s30, 7  ;;  %s272_s15 = scalar_lea.vmem [#allocation2], %s1273_s10 }
  0x63   : > { %s281_s1 = sshll.u32 %s272_s15, 4  ;;  %s2384_s0 = sld [smem:[#allocation24_spill]]  ;;  %s2009_s1 = int_to_ptr.vmem [resolvable:$true] %s281_s1 }
  0x64   : > { %s2002_s2 = scalar_select %p49_p13, %s1771_s23, %s51_s12  }
  0x65   : > { %p2015_p0 = pnand %p1384_p12, %p1989_p9  ;;  %s269_s12 = scalar_lea.sflag [#allocation3], %s268_s20 }
  0x67   : > { %p1569_p4 = pneg %p2015_p0 }
  0x69   : > { %s2007_s6 = scalar_lea.hbm %s2384_s0, %s1275_s8  ;;  %s1572_s19 = scalar_lea.hbm %s2384_s0, 512 }
  0x6a   : > { %s1567_s10 = scalar_lea.hbm %s2007_s6, 128  ;;  %p1573_p11 = scmp.lt.u32.totalorder %s2007_s6, %s2384_s0 }
  0x6b   : > { %p1568_p2 = scmp.ne.s32.totalorder %s2007_s6, %s1567_s10  ;;  %p1574_p10 = scmp.lt.u32.totalorder %s1572_s19, %s1567_s10 }
  0x6c   : > { %p1576_p3 = scmp.lt.u32.totalorder %s1567_s10, %s2007_s6 }
  0x6d   : > { %p1570_p6 = pnand %p1569_p4, %p1568_p2  ;;  %p1575_p1 = por %p1574_p10, %p1573_p11 }
  0x6f   : > { %p1571_p8 = pneg %p1570_p6  ;;  %p1577_p5 = por %p1576_p3, %p1575_p1 }
  0x71   : > { %p1578_p9 = pnand %p1577_p5, %p1571_p8 }
  0x73   : > { %1581 = shalt.err (!%p1578_p9)
}
  0x74   : > { %s1582_s20 = scalar_lea.vmem %s2009_s1, 128  ;;  %s1799_s21 = smov [#allocation2]  }
  0x75   : > { %p1583_p12 = scmp.ne.s32.totalorder %s2009_s1, %s1582_s20  ;;  %s1587_s30 = sshll.u32 %s1799_s21, 4  ;;  %s1588_s30 = int_to_ptr.vmem [resolvable:$false] %s1587_s30 }
  0x76   : > { %s1589_s8 = scalar_lea.vmem %s1588_s30, 256  ;;  %p1590_p6 = scmp.lt.s32.totalorder %s2009_s1, %s1588_s30 }
  0x77   : > { %p1585_p13 = pnand %p1583_p12, %p1569_p4  ;;  %p1591_p11 = scmp.lt.s32.totalorder %s1589_s8, %s1582_s20 }
  0x79   : > { %p1586_p2 = pneg %p1585_p13  ;;  %p1592_p10 = por %p1591_p11, %p1590_p6 }
  0x7b   : > { %p1593_p1 = pnand %p1592_p10, %p1586_p2 }
  0x7d   : > { %1596 = shalt.err (!%p1593_p1)
}
  0x7e   : > { %1368 = dma.hbm_to_vmem [thread:$0]  (!%p2015_p0), %s2007_s6, 128, %s2009_s1, %s269_s12  }
  0x7f   : > { %p2386_p8 = scmp.ne.s32.totalorder %s2376_s9, 0 }
  0x80   : > { %s2047_s15 = sand.u32 (!%p2386_p8), 1, %s1767_s22   ;;  %p2387_p4 = scmp.ne.s32.totalorder (!%p2386_p8), %s2373_s7, 0 }
  0x81   : > { %290 = sbr.rel (%p2386_p8) target bundleno = 762 (0x2fa), region = 32  ;;  %s2050_s10 = sshll.u32 (!%p2386_p8), %s2047_s15, 3 }
  0x82   : > { %s293_s3 = scalar_lea.sflag (!%p2386_p8), [#allocation3], %s2047_s15  ;;  %s296_s16 = scalar_lea.vmem (!%p2386_p8), [#allocation2], %s2050_s10 }
  0x88   : > { %1742 = dma.done.wait (%p2387_p4), %s293_s3, 128  }
  0x89   : > { %1744 = vsyncadd (%p2387_p4), %s293_s3, 4294967168  ;;  %p2388_p0 = scmp.eq.s32.totalorder %s1892_s29, 0 }
  0x8b   : > { %1746 = dma.done.wait (%p2388_p0), [#allocation6], 1056   ;;  %p2389_p3 = pmov %p2388_p0 }
  0x8c   : > { %v2062_v0 = vld [vmem:[%s296_s16] sm:$0xff]  ;;  %vm351_vm0 = vcmask 523264   ;;  %v1485_v3 = vld [vmem:[#allocation5 + $0x4] ss:$8 sps:$4 sm:$0xff]   ;;  %v1487_v4 = vld [vmem:[#allocation5] ss:$8 sps:$4 sm:$0xff]   ;;  %v470_v12 = vlaneseq }
  0x8d   : > { %1748 = vsyncadd (%p2389_p3), [#allocation6], 4294966240  ;;  %v350_v1 = vmul.f32 %v2062_v0, %v2062_v0  ;;  %412 = vmatprep.subr.bf16.mxu0 %v1485_v3  ;;  %v1488_v5 = vld [vmem:[#allocation5 + $0x14] ss:$8 sps:$4 sm:$0xff]   ;;  %v1490_v6 = vld [vmem:[#allocation5 + $0x10] ss:$8 sps:$4 sm:$0xff]  }
  0x8e   : > { %413 = vmatpush1.bf16.msra.mxu0 %v1487_v4  ;;  %v1491_v7 = vld [vmem:[#allocation5 + $0x24] ss:$8 sps:$4 sm:$0xff]   ;;  %v1800_v8 = vmov 0   ;;  %v1493_v9 = vld [vmem:[#allocation5 + $0x20] ss:$8 sps:$4 sm:$0xff]   ;;  %s1295_s1 = sshll.u32 %s1775_s24, 3 }
  0x8f   : > { %v352_v2 = vsel %vm351_vm0, %v350_v1, 0.0  ;;  %414 = vmatprep.subr.bf16.mxu0 %v1488_v5  ;;  %444 = vmatprep.mubr.bf16.mxu0 %v1800_v8  ;;  %v1494_v10 = vld [vmem:[#allocation5 + $0x34] ss:$8 sps:$4 sm:$0xff]   ;;  %v1496_v11 = vld [vmem:[#allocation5 + $0x30] ss:$8 sps:$4 sm:$0xff]   ;;  %v472_v13 = vstv %s1295_s1  ;;  %v471_v14 = vshrl.u32 %v470_v12, 7 }
  0x90   : > { %353 = vadd.xlane.f32.xlu0 %v352_v2  ;;  %v1296_v16 = vld [vmem:[#allocation7] ss:$0 sm:$0xff]  ;;  %v1305_v17 = vld [vmem:[#allocation7 + $0x1] ss:$0 sm:$0xff]  ;;  %v1801_v43 = vmov 683565275  }
  0x91   : > { %v473_v15 = vadd.s32 %v472_v13, %v471_v14  ;;  %v1802_v45 = vmov 2475754826   ;;  %v1803_v47 = vmov 2131351028   ;;  %v1804_v49 = vmov 2102212464  }
  0x92   : > { %415 = vmatpush1.bf16.msra.mxu0 %v1490_v6  ;;  %v1805_v51 = vmov 920167782   ;;  %v1806_v59 = vmov 1326507024   ;;  %s2362_s6 = smov 64   ;;  %s1808_s7 = smov 96  }
  0x93   : > { %416 = vmatprep.subr.bf16.mxu0 %v1491_v7  ;;  %v474_v18 = vcvt.s32.f32 %v473_v15  ;;  %s1809_s9 = smov 32   ;;  %s2150_s18 = scalar_lea.vmem [#allocation11], %s2050_s10 }
  0x94   : > { %s1321_s12 = sshll.u32 %s1779_s25, 2  ;;  %s1283_s19 = sshll.u32 %s2047_s15, 2 }
  0x95   : > { %v2068_v19 = vmul.f32 %v1296_v16, %v474_v18  ;;  %v2070_v20 = vmul.f32 %v1305_v17, %v474_v18  ;;  %s1009_s13 = sadd.s32 %s1775_s24, %s1321_s12  ;;  %s1046_s11 = sshll.u32 %s2150_s18, 4  ;;  %s2168_s11 = int_to_ptr.vmem [resolvable:$true] %s1046_s11 }
  0x96   : > { %417 = vmatpush1.bf16.msra.mxu0 %v1493_v9  ;;  %s1327_s20 = sshll.u32 %s1779_s25, 1  ;;  %s2166_s30 = sshll.u32 %s1009_s13, 6 }
  0x97   : > { %418 = vmatprep.subr.bf16.mxu0 %v1494_v10  ;;  %v483_v21 = vand.u32 2147483647, %v2068_v19  ;;  %v486_v22 = vand.u32 2139095040, %v2068_v19  ;;  %v732_v23 = vand.u32 2147483647, %v2070_v20  ;;  %v735_v24 = vand.u32 2139095040, %v2070_v20  ;;  %s1060_s8 = sadd.s32 %s1775_s24, %s1327_s20  ;;  %s2177_s16 = scalar_lea.hbm %s2350_s4, %s2166_s30 }
  0x98   : > { %vm485_vm15 = vcmp.lt.s32.totalorder %v2068_v19, 0  ;;  %s1328_s24 = sshll.u32 %s1060_s8, 6  ;;  %s347_s1 = scalar_lea.vmem [#allocation12], %s1283_s19 }
  0x99   : > { %v487_v25 = vshrl.u32 %v486_v22, 23  ;;  %v490_v26 = vand.u32 8388607, %v483_v21  ;;  %v736_v27 = vshrl.u32 %v735_v24, 23  ;;  %v739_v28 = vand.u32 8388607, %v732_v23  ;;  %s2188_s3 = scalar_lea.hbm %s2351_s5, %s2166_s30 }
  0x9a   : > { %419 = vmatpush1.bf16.msra.mxu0 %v1496_v11  ;;  %s333_s12 = scalar_lea.vmem [#allocation9], %s2050_s10  ;;  %s2391_s25 = sld [smem:[#allocation27_spill]] }
  0x9b   : > { %v1297_v29 = vadd.s32 4294967169, %v487_v25  ;;  %v1306_v30 = vadd.s32 4294967169, %v736_v27  ;;  %v491_v32 = vor.u32 8388608, %v490_v26  ;;  %v740_v33 = vor.u32 8388608, %v739_v28  ;;  %s1029_s13 = sshll.u32 %s333_s12, 4  ;;  %s1810_s8 = smov [#allocation12]   ;;  %s2200_s13 = int_to_ptr.vmem [resolvable:$true] %s1029_s13 }
  0x9c   : > { %s1601_s27 = sshll.u32 %s1810_s8, 4  ;;  %s1602_s27 = int_to_ptr.vmem [resolvable:$false] %s1601_s27 }
  0x9d   : > { %v493_v31 = vadd.s32 1, %v1297_v29  ;;  %v742_v34 = vadd.s32 1, %v1306_v30  ;;  %v2080_v39 = vshll.u32 %v491_v32, 8  ;;  %v2082_v41 = vshll.u32 %v740_v33, 8 }
  0x9f   : > { %vm494_vm1 = vcmp.gt.s32.totalorder %v493_v31, 0  ;;  %vm743_vm2 = vcmp.gt.s32.totalorder %v742_v34, 0 }
  0xa0   : > { %v495_v35 = vsel %vm494_vm1, %v493_v31, 0  ;;  %v744_v38 = vsel %vm743_vm2, %v742_v34, 0  ;;  %vm484_vm1 = vcmp.le.f32.partialorder %v483_v21, 0.7853982  ;;  %vm734_vm2 = vcmp.lt.s32.totalorder %v2070_v20, 0  ;;  %s2392_s0 = smov %s2391_s25  ;;  %s2207_s17 = scalar_lea.hbm %s2391_s25, %s2166_s30 }
  0xa1   : > { %v496_v36 = vshrl.u32 %v495_v35, 5  ;;  %v497_v37 = vand.u32 31, %v495_v35  ;;  %v746_v40 = vand.u32 31, %v744_v38  ;;  %v2084_v53 = vshrl.u32 %v744_v38, 5 }
  0xa3   : > { %v498_v42 = vsub.s32 32, %v497_v37  ;;  %v500_v44 = vshll.u32 %v1801_v43, %v497_v37  ;;  %v503_v46 = vshll.u32 %v1802_v45, %v497_v37  ;;  %v506_v48 = vshll.u32 %v1803_v47, %v497_v37 }
  0xa4   : > { %v509_v50 = vshll.u32 %v1804_v49, %v497_v37  ;;  %v512_v52 = vshll.u32 %v1805_v51, %v497_v37  ;;  %vm515_vm3 = vcmp.lt.s32.totalorder %v496_v36, 1  ;;  %vm516_vm4 = vcmp.lt.s32.totalorder %v496_v36, 2 }
  0xa5   : > { %v499_v54 = vshrl.u32 %v1801_v43, %v498_v42  ;;  %v501_v55 = vshrl.u32 %v1802_v45, %v498_v42  ;;  %v504_v56 = vshrl.u32 %v1803_v47, %v498_v42  ;;  %v507_v57 = vshrl.u32 %v1804_v49, %v498_v42 }
  0xa6   : > { %v510_v58 = vshrl.u32 %v1805_v51, %v498_v42  ;;  %v513_v60 = vshrl.u32 %v1806_v59, %v498_v42  ;;  %vm518_vm5 = vcmp.lt.s32.totalorder %v496_v36, 4  ;;  %v747_v1 = vsub.s32 32, %v746_v40 }
  0xa7   : > { %v502_v61 = vor.u32 %v501_v55, %v500_v44  ;;  %v505_v62 = vor.u32 %v504_v56, %v503_v46  ;;  %v508_v63 = vor.u32 %v507_v57, %v506_v48  ;;  %vm517_vm6 = vcmp.lt.s32.totalorder %v496_v36, 3 }
  0xa8   : > { %v511_v2 = vor.u32 %v510_v58, %v509_v50  ;;  %v514_v3 = vor.u32 %v513_v60, %v512_v52  ;;  %v749_v4 = vshll.u32 %v1801_v43, %v746_v40  ;;  %v752_v12 = vshll.u32 %v1802_v45, %v746_v40 }
  0xa9   : > { %v519_v5 = vsel %vm515_vm3, %v499_v54, %v502_v61  ;;  %v520_v6 = vsel %vm518_vm5, %v508_v63, 2102212464  ;;  %v523_v7 = vsel %vm515_vm3, %v502_v61, %v505_v62  ;;  %v527_v8 = vsel %vm515_vm3, %v505_v62, %v508_v63 }
  0xaa   : > { %v521_v9 = vsel %vm517_vm6, %v505_v62, %v520_v6  ;;  %v524_v10 = vsel %vm518_vm5, %v511_v2, 920167782  ;;  %v528_v11 = vsel %vm518_vm5, %v514_v3, 1326507024  ;;  %v748_v15 = vshrl.u32 %v1801_v43, %v747_v1 }
  0xab   : > { %v525_v13 = vsel %vm517_vm6, %v508_v63, %v524_v10  ;;  %v529_v14 = vsel %vm517_vm6, %v511_v2, %v528_v11  ;;  %v750_v16 = vshrl.u32 %v1802_v45, %v747_v1  ;;  %v522_v17 = vsel %vm516_vm4, %v519_v5, %v521_v9 }
  0xac   : > { %v526_v18 = vsel %vm516_vm4, %v523_v7, %v525_v13  ;;  %v530_v22 = vsel %vm516_vm4, %v527_v8, %v529_v14  ;;  %v753_v24 = vshrl.u32 %v1803_v47, %v747_v1  ;;  %v755_v31 = vshll.u32 %v1803_v47, %v746_v40 }
  0xad   : > { %v2093_v25 = vmul.u32.u64.low %v2080_v39, %v530_v22  ;;  %v2094_v26 = vmul.u32.u64.high %v2080_v39, %v530_v22, %v2093_v25  ;;  %v2097_v27 = vmul.u32.u64.low %v2080_v39, %v526_v18  ;;  %v2098_v28 = vmul.u32.u64.high %v2080_v39, %v526_v18, %v2097_v27 }
  0xae   : > { %v751_v29 = vor.u32 %v750_v16, %v749_v4  ;;  %v754_v30 = vor.u32 %v753_v24, %v752_v12  ;;  %v756_v32 = vshrl.u32 %v1804_v49, %v747_v1  ;;  %v758_v33 = vshll.u32 %v1804_v49, %v746_v40 }
  0xaf   : > { %v759_v34 = vshrl.u32 %v1805_v51, %v747_v1  ;;  %v761_v35 = vshll.u32 %v1805_v51, %v746_v40  ;;  %v762_v37 = vshrl.u32 %v1806_v59, %v747_v1  ;;  %v538_v36 = vmul.u32 %v2080_v39, %v522_v17 }
  0xb0   : > { %v757_v38 = vor.u32 %v756_v32, %v755_v31  ;;  %vm764_vm7 = vcmp.lt.s32.totalorder %v2084_v53, 1  ;;  %vm765_vm8 = vcmp.lt.s32.totalorder %v2084_v53, 2  ;;  %vm540_vm9 = vc.u32 %v2094_v26, %v2097_v27 }
  0xb1   : > { %v541_v42 = vadd.s32 1, %v2098_v28  ;;  %v760_v43 = vor.u32 %v759_v34, %v758_v33  ;;  %vm766_vm10 = vcmp.lt.s32.totalorder %v2084_v53, 3  ;;  %v763_v44 = vor.u32 %v762_v37, %v761_v35 }
  0xb2   : > { %vm767_vm11 = vcmp.lt.s32.totalorder %v2084_v53, 4  ;;  %v768_v45 = vsel %vm764_vm7, %v748_v15, %v751_v29  ;;  %v772_v40 = vsel %vm764_vm7, %v751_v29, %v754_v30  ;;  %v776_v48 = vsel %vm764_vm7, %v754_v30, %v757_v38 }
  0xb3   : > { %v542_v46 = vsel %vm540_vm9, %v541_v42, %v2098_v28  ;;  %v769_v39 = vsel %vm767_vm11, %v757_v38, 2102212464  ;;  %v773_v47 = vsel %vm767_vm11, %v760_v43, 920167782  ;;  %v777_v52 = vsel %vm767_vm11, %v763_v44, 1326507024 }
  0xb4   : > { %v543_v49 = vadd.s32 %v542_v46, %v538_v36  ;;  %v770_v50 = vsel %vm766_vm10, %v754_v30, %v769_v39  ;;  %v774_v51 = vsel %vm766_vm10, %v757_v38, %v773_v47  ;;  %v778_v56 = vsel %vm766_vm10, %v760_v43, %v777_v52 }
  0xb5   : > { %v771_v54 = vsel %vm765_vm8, %v768_v45, %v770_v50  ;;  %v775_v55 = vsel %vm765_vm8, %v772_v40, %v774_v51  ;;  %v779_v58 = vsel %vm765_vm8, %v776_v48, %v778_v56  ;;  %v539_v14 = vadd.s32 %v2097_v27, %v2094_v26 }
  0xb6   : > { %v544_v57 = vadd.s32 536870912, %v543_v49  ;;  %v2115_v59 = vmul.u32.u64.low %v2082_v41, %v775_v55  ;;  %v2116_v60 = vmul.u32.u64.high %v2082_v41, %v775_v55, %v2115_v59  ;;  %v787_v1 = vmul.u32 %v2082_v41, %v771_v54 }
  0xb7   : > { %v2119_v61 = vmul.u32.u64.low %v2082_v41, %v779_v58  ;;  %v2120_v62 = vmul.u32.u64.high %v2082_v41, %v779_v58, %v2119_v61  ;;  %vm733_vm3 = vcmp.le.f32.partialorder %v732_v23, 0.7853982  ;;  %vm575_vm10 = vweird.f32 %v2068_v19 }
  0xb8   : > { %v545_v63 = vshrl.u32 %v544_v57, 30  ;;  %v790_v3 = vadd.s32 1, %v2116_v60 }
  0xb9   : > { %vm789_vm12 = vc.u32 %v2120_v62, %v2115_v59  ;;  %v788_v34 = vadd.s32 %v2115_v59, %v2120_v62 }
  0xba   : > { %v546_v2 = vshll.u32 %v545_v63, 30  ;;  %v791_v53 = vsel %vm789_vm12, %v790_v3, %v2116_v60  ;;  %v569_v26 = vsub.s32 4, %v545_v63 }
  0xbb   : > { %v792_v5 = vadd.s32 %v791_v53, %v787_v1 }
  0xbc   : > { %v547_v4 = vsub.s32 %v543_v49, %v546_v2  ;;  %v570_v40 = vsel %vm485_vm15, %v569_v26, %v545_v63 }
  0xbd   : > { %v793_v7 = vadd.s32 536870912, %v792_v5  ;;  %v572_v49 = vsel %vm484_vm1, 0, %v570_v40 }
  0xbe   : > { %v549_v6 = vsub.s32 0, %v547_v4  ;;  %v679_v54 = vadd.s32 3, %v572_v49  ;;  %v576_v58 = vand.u32 3, %v572_v49 }
  0xbf   : > { %v794_v9 = vshrl.u32 %v793_v7, 30 }
  0xc0   : > { %v1298_v8 = vmin.u32 %v549_v6, %v547_v4  ;;  %v680_v57 = vand.u32 3, %v679_v54  ;;  %vm581_vm5 = vcmp.eq.s32.totalorder %v576_v58, 2  ;;  %vm578_vm7 = vcmp.eq.s32.totalorder %v576_v58, 0 }
  0xc1   : > { %v795_v11 = vshll.u32 %v794_v9, 30  ;;  %v818_v56 = vsub.s32 4, %v794_v9  ;;  %vm577_vm9 = vcmp.lt.s32.totalorder %v576_v58, 2 }
  0xc2   : > { %v551_v10 = vclz %v1298_v8  ;;  %vm685_vm4 = vcmp.eq.s32.totalorder %v680_v57, 2  ;;  %vm682_vm6 = vcmp.eq.s32.totalorder %v680_v57, 0  ;;  %vm681_vm8 = vcmp.lt.s32.totalorder %v680_v57, 2 }
  0xc3   : > { %v796_v13 = vsub.s32 %v792_v5, %v795_v11  ;;  %v819_v60 = vsel %vm734_vm2, %v818_v56, %v794_v9 }
  0xc4   : > { %v1299_v12 = vadd.s32 4294967294, %v551_v10  ;;  %v821_v63 = vsel %vm733_vm3, 0, %v819_v60 }
  0xc5   : > { %v798_v15 = vsub.s32 0, %v796_v13  ;;  %v928_v3 = vadd.s32 3, %v821_v63  ;;  %v825_v8 = vand.u32 3, %v821_v63 }
  0xc6   : > { %vm1300_vm13 = vcmp.lt.s32.totalorder %v1299_v12, 0 }
  0xc7   : > { %v554_v41 = vsel %vm1300_vm13, 0, %v1299_v12  ;;  %v1307_v22 = vmin.u32 %v798_v15, %v796_v13  ;;  %v929_v9 = vand.u32 3, %v928_v3  ;;  %vm830_vm11 = vcmp.eq.s32.totalorder %v825_v8, 2 }
  0xc8   : > { %v555_v16 = vsub.s32 32, %v554_v41  ;;  %v556_v17 = vshll.u32 %v547_v4, %v554_v41  ;;  %v559_v18 = vsub.s32 4294967266, %v554_v41  ;;  %vm827_vm13 = vcmp.eq.s32.totalorder %v825_v8, 0 }
  0xc9   : > { %v800_v28 = vclz %v1307_v22  ;;  %vm934_vm12 = vcmp.eq.s32.totalorder %v929_v9, 2 }
  0xca   : > { %v557_v24 = vshrl.u32 %v539_v14, %v555_v16  ;;  %v560_v25 = vadd.s32 127, %v559_v18 }
  0xcb   : > { %v1308_v31 = vadd.s32 4294967294, %v800_v28 }
  0xcc   : > { %v558_v29 = vor.u32 %v557_v24, %v556_v17  ;;  %v561_v30 = vshll.u32 %v560_v25, 23 }
  0xcd   : > { %vm1309_vm14 = vcmp.lt.s32.totalorder %v1308_v31, 0 }
  0xce   : > { %v562_v32 = vor.u32 4788187, %v561_v30  ;;  %v565_v33 = vcvt.s32.f32 %v558_v29  ;;  %v803_v27 = vsel %vm1309_vm14, 0, %v1308_v31  ;;  %vm931_vm14 = vcmp.eq.s32.totalorder %v929_v9, 0 }
  0xcf   : > { %v804_v37 = vsub.s32 32, %v803_v27  ;;  %v805_v36 = vshll.u32 %v796_v13, %v803_v27  ;;  %v808_v38 = vsub.s32 4294967266, %v803_v27 }
  0xd0   : > { %v563_v35 = vand.u32 2147483647, %v562_v32 }
  0xd1   : > { %v806_v43 = vshrl.u32 %v788_v34, %v804_v37  ;;  %v809_v44 = vadd.s32 127, %v808_v38 }
  0xd2   : > { %v566_v42 = vmul.f32 %v565_v33, %v563_v35 }
  0xd3   : > { %v807_v46 = vor.u32 %v806_v43, %v805_v36  ;;  %v810_v39 = vshll.u32 %v809_v44, 23 }
  0xd4   : > { %v567_v45 = vxor.u32 2147483648, %v566_v42 }
  0xd5   : > { %v811_v50 = vor.u32 4788187, %v810_v39  ;;  %v814_v51 = vcvt.s32.f32 %v807_v46 }
  0xd6   : > { %v568_v47 = vsel %vm485_vm15, %v567_v45, %v566_v42  ;;  %vm826_vm15 = vcmp.lt.s32.totalorder %v825_v8, 2 }
  0xd7   : > { %v571_v48 = vsel %vm484_vm1, %v2068_v19, %v568_v47  ;;  %v812_v52 = vand.u32 2147483647, %v811_v50  ;;  %vm930_vm1 = vcmp.lt.s32.totalorder %v929_v9, 2 }
  0xd8   : > { %1497 = vcosq.f32 %v571_v48 }
  0xd9   : > { %1499 = vsinq.f32 %v571_v48  ;;  %v815_v55 = vmul.f32 %v814_v51, %v812_v52 }
  0xdb   : > { %v816_v21 = vxor.u32 2147483648, %v815_v55 }
  0xdd   : > { %v817_v59 = vsel %vm734_vm2, %v816_v21, %v815_v55  ;;  %vm824_vm2 = vweird.f32 %v2070_v20 }
  0xde   : > { %v820_v61 = vsel %vm733_vm3, %v2070_v20, %v817_v59  ;;  %vm721_vm3 = vcmask 257024  }
  0xdf   : > { %1501 = vcosq.f32 %v820_v61 }
  0xe0   : > { %1503 = vsinq.f32 %v820_v61 }
  0xe2   : > { %v1498_v62 = vpop.eup %1497 }
  0xe3   : > { %v1500_v1 = vpop.eup %1499  ;;  %v582_v2 = vxor.u32 2147483648, %v1498_v62 }
  0xe4   : > { %v579_v4 = vxor.u32 2147483648, %v1500_v1 }
  0xe5   : > { %v687_v23 = vsel %vm685_vm4, %v582_v2, %v1500_v1  ;;  %v583_v53 = vsel %vm581_vm5, %v582_v2, %v1500_v1  ;;  %vm467_vm4 = vcmask 519168  }
  0xe6   : > { %v684_v5 = vsel %vm682_vm6, %v1498_v62, %v579_v4  ;;  %v580_v6 = vsel %vm578_vm7, %v1498_v62, %v579_v4 }
  0xe7   : > { %v688_v7 = vsel %vm681_vm8, %v684_v5, %v687_v23  ;;  %v584_v10 = vsel %vm577_vm9, %v580_v6, %v583_v53 }
  0xe8   : > { %v689_v11 = vsel %vm575_vm10, nan, %v688_v7  ;;  %v2137_v12 = vsel %vm575_vm10, nan, %v584_v10 }
  0xe9   : > { %706 = vrot.lane.b32.xlu1 %v689_v11, %s2362_s6  ;;  %701 = vrot.lane.b32.xlu0 %v2137_v12, %s2362_s6  ;;  %v1502_v13 = vpop.eup %1501 }
  0xea   : > { %v1504_v19 = vpop.eup %1503  ;;  %v831_v14 = vxor.u32 2147483648, %v1502_v13 }
  0xeb   : > { %v828_v41 = vxor.u32 2147483648, %v1504_v19 }
  0xec   : > { %v832_v15 = vsel %vm830_vm11, %v831_v14, %v1504_v19  ;;  %v936_v16 = vsel %vm934_vm12, %v831_v14, %v1504_v19 }
  0xed   : > { %v829_v17 = vsel %vm827_vm13, %v1502_v13, %v828_v41  ;;  %v933_v18 = vsel %vm931_vm14, %v1502_v13, %v828_v41 }
  0xee   : > { %v833_v22 = vsel %vm826_vm15, %v829_v17, %v832_v15  ;;  %v937_v24 = vsel %vm930_vm1, %v933_v18, %v936_v16 }
  0xef   : > { %v834_v25 = vsel %vm824_vm2, nan, %v833_v22  ;;  %v938_v28 = vsel %vm824_vm2, nan, %v937_v24 }
  0xf0   : > { %957 = vrot.lane.b32.xlu1 %v834_v25, %s1808_s7 }
  0xf4   : > { %961 = vrot.lane.b32.xlu1 %v938_v28, %s1808_s7 }
  0xf8   : > { %940 = vrot.lane.b32.xlu1 %v834_v25, %s1809_s9 }
  0xfc   : > { %945 = vrot.lane.b32.xlu1 %v938_v28, %s1809_s9 }
 0x11d   : > { %v354_v29 = vpop.xlane.xlu0 %353 }
 0x11e   : > { %v356_v30 = vmul.f32 0.015625, %v354_v29 }
 0x120   : > { %v357_v20 = vadd.f32 1e-06, %v356_v30 }
 0x122   : > { %1505 = vrsqrt.f32 %v357_v20 }
 0x12c   : > { %v1506_v31 = vpop.eup %1505 }
 0x12d   : > { %v359_v32 = vmul.f32 %v1506_v31, %v2062_v0 }
 0x12f   : > { %v360_v33 = vpack.c.bf16 %v359_v32, %v359_v32 }
 0x131   : > { %1292 = vmatmul.mubr.msk.bf16.vlgmr.msra.gmra.mrb[0].mxu0 %vm351_vm0, %v360_v33  ;;  %vm696_vm0 = vcmask 261120  }
 0x15b   : > { %v707_v42 = vpop.permute.xlu1 %706  ;;  %v702_v46 = vpop.permute.xlu0 %701 }
 0x162   : > { %v958_v0 = vpop.permute.xlu1 %957 }
 0x166   : > { %v962_v44 = vpop.permute.xlu1 %961 }
 0x16a   : > { %v941_v51 = vpop.permute.xlu1 %940 }
 0x16e   : > { %v946_v21 = vpop.permute.xlu1 %945 }
 0x204   : > { %v446_v34 = vpop.f32.mrb[0].mxu0 }
 0x205   : > { %v1293_v35 = vmul.f32 -1.442695, %v446_v34  ;;  %v448_v26 = vpop.f32.mrb[1].mxu0 }
 0x206   : > { %v460_v27 = vpack.c.bf16 %v448_v26, %v448_v26  ;;  %v450_v37 = vpop.f32.mrb[2].mxu0 }
 0x207   : > { %1507 = vpow2.f32 %v1293_v35  ;;  %v451_v36 = vpop.f32.mrb[3].mxu0 }
 0x208   : > { %722 = vst.msk [vmem:[%s2150_s18] sm:$0xf] %vm721_vm3, %v460_v27 }
 0x211   : > { %v1508_v38 = vpop.eup %1507 }
 0x212   : > { %v456_v43 = vadd.f32 1.0, %v1508_v38 }
 0x214   : > { %1509 = vrcp.f32 %v456_v43 }
 0x21e   : > { %v1510_v45 = vpop.eup %1509 }
 0x21f   : > { %v459_v40 = vmul.f32 %v1510_v45, %v446_v34 }
 0x221   : > { %v691_v39 = vmul.f32 %v689_v11, %v459_v40  ;;  %v960_v47 = vmul.f32 %v958_v0, %v459_v40  ;;  %v964_v48 = vmul.f32 %v962_v44, %v459_v40  ;;  %v704_v49 = vmul.f32 %v702_v46, %v459_v40 }
 0x222   : > { %v709_v52 = vmul.f32 %v707_v42, %v459_v40  ;;  %v943_v54 = vmul.f32 %v941_v51, %v459_v40  ;;  %v690_v59 = vmul.f32 %v2137_v12, %v459_v40  ;;  %v948_v53 = vmul.f32 %v946_v21, %v459_v40 }
 0x223   : > { %v1480_v50 = vpack.i.bf16 %v691_v39, %v960_v47  ;;  %v1470_v55 = vpack.i.bf16 %v964_v48, %v704_v49 }
 0x224   : > { %v1475_v56 = vpack.i.bf16 %v943_v54, %v709_v52 }
 0x225   : > { %1481 = vrot.lane.b32.xlu0 %v1480_v50, %s1809_s9  ;;  %1471 = vrot.lane.b32.xlu1 %v1470_v55, %s2362_s6  ;;  %s326_s9 = scalar_lea.vmem [#allocation8], %s2050_s10 }
 0x229   : > { %977 = vrot.lane.b32.xlu0 %v460_v27, %s1808_s7  ;;  %1476 = vrot.lane.b32.xlu1 %v1475_v56, %s1808_s7  ;;  %s1064_s7 = sshll.u32 %s347_s1, 4  ;;  %s2198_s7 = int_to_ptr.vmem [resolvable:$true] %s1064_s7 }
 0x22a   : > { %s1597_s19 = scalar_lea.vmem %s2198_s7, 64  ;;  %p1604_p13 = scmp.lt.s32.totalorder %s2198_s7, %s1602_s27 }
 0x22b   : > { %p1598_p5 = scmp.ne.s32.totalorder %s2198_s7, %s1597_s19 }
 0x22d   : > { %464 = vrot.lane.b32.xlu1 %v460_v27, %s2362_s6  ;;  %s2390_s6 = sld [smem:[#allocation28_spill]]  ;;  %p1599_p9 = pnand %p1598_p5, %p1985_p7 }
 0x22f   : > { %p1600_p12 = pneg %p1599_p9 }
 0x233   : > { %s2196_s21 = scalar_lea.hbm %s2390_s6, %s1328_s24  ;;  %s998_s24 = scalar_lea.sflag [#allocation13], %s2047_s15 }
 0x297   : > { %v1482_v57 = vpop.permute.xlu0 %1481  ;;  %v1472_v58 = vpop.permute.xlu1 %1471 }
 0x298   : > { %v1484_v60 = vunpack.i.h.bf16 %v1482_v57  ;;  %v1483_v61 = vunpack.i.l.bf16 %v1482_v57  ;;  %v1474_v62 = vunpack.i.h.bf16 %v1472_v58  ;;  %v1473_v5 = vunpack.i.l.bf16 %v1472_v58 }
 0x29a   : > { %v697_v63 = vsel %vm696_vm0, %v690_v59, %v1484_v60  ;;  %v973_v2 = vsel %vm696_vm0, %v1483_v61, %v1474_v62 }
 0x29b   : > { %v698_v1 = vpack.c.bf16 %v697_v63, %v697_v63  ;;  %v978_v3 = vpop.permute.xlu0 %977  ;;  %v974_v4 = vpack.c.bf16 %v973_v2, %v973_v2  ;;  %v1477_v23 = vpop.permute.xlu1 %1476 }
 0x29c   : > { %1316 = vst.msk [vmem:[%s2150_s18 + $0x4] sm:$0xf] %vm721_vm3, %v978_v3  ;;  %v1479_v6 = vunpack.i.h.bf16 %v1477_v23  ;;  %v1478_v7 = vunpack.i.l.bf16 %v1477_v23  ;;  %s1012_s18 = sshll.u32 %s326_s9, 4  ;;  %s2209_s18 = int_to_ptr.vmem [resolvable:$true] %s1012_s18 }
 0x29d   : > { %699 = vst.msk [vmem:[%s326_s9] sm:$0xf] %vm467_vm4, %v698_v1  ;;  %1315 = vst.msk [vmem:[%s333_s12 + $0x4] sm:$0xf] %vm467_vm4, %v974_v4 }
 0x29e   : > { %v953_v8 = vsel %vm696_vm0, %v1479_v6, %v948_v53  ;;  %v718_v9 = vsel %vm696_vm0, %v1473_v5, %v1478_v7 }
 0x29f   : > { %v954_v10 = vpack.c.bf16 %v953_v8, %v953_v8  ;;  %v719_v11 = vpack.c.bf16 %v718_v9, %v718_v9  ;;  %v465_v12 = vpop.permute.xlu1 %464 }
 0x2a0   : > { %468 = vst.msk [vmem:[%s347_s1] sm:$0xf] %vm467_vm4, %v465_v12  ;;  %s1603_s1 = scalar_lea.vmem %s1602_s27, 128 }
 0x2a1   : > { %720 = vst.msk [vmem:[%s333_s12] sm:$0xf] %vm467_vm4, %v719_v11  ;;  %1314 = vst.msk [vmem:[%s326_s9 + $0x4] sm:$0xf] %vm467_vm4, %v954_v10  ;;  %p1605_p2 = scmp.lt.s32.totalorder %s1603_s1, %s1597_s19 }
 0x2a3   : > { %p1606_p6 = por %p1605_p2, %p1604_p13 }
 0x2a5   : > { %p1607_p11 = pnand %p1606_p6, %p1600_p12 }
 0x2a7   : > { %1610 = shalt.err (!%p1607_p11)
}
 0x2a8   : > { %s1611_s30 = scalar_lea.hbm %s2196_s21, 64  ;;  %s1615_s10 = scalar_lea.hbm %s2390_s6, 256 }
 0x2a9   : > { %p1612_p10 = scmp.ne.s32.totalorder %s2196_s21, %s1611_s30  ;;  %p1616_p4 = scmp.lt.u32.totalorder %s2196_s21, %s2390_s6 }
 0x2aa   : > { %p1617_p0 = scmp.lt.u32.totalorder %s1615_s10, %s1611_s30  ;;  %p1619_p5 = scmp.lt.u32.totalorder %s1611_s30, %s2196_s21 }
 0x2ab   : > { %p1613_p1 = pnand %p1612_p10, %p1985_p7 }
 0x2ac   : > { %p1618_p3 = por %p1617_p0, %p1616_p4 }
 0x2ad   : > { %p1614_p8 = pneg %p1613_p1 }
 0x2ae   : > { %p1620_p9 = por %p1619_p5, %p1618_p3 }
 0x2b0   : > { %p1621_p12 = pnand %p1620_p9, %p1614_p8 }
 0x2b2   : > { %1624 = shalt.err (!%p1621_p12)
}
 0x2b3   : > { %1353 = dma.vmem_to_hbm [thread:$0]  (%p1985_p7), %s2198_s7, 64, %s2196_s21, %s998_s24  }
 0x2b4   : > { %s2393_s25 = sand.u32 1, %s1892_s29   ;;  %s1625_s8 = scalar_lea.vmem %s2200_s13, 128 }
 0x2b5   : > { %s2237_s19 = scalar_lea.sflag [#allocation10], %s2393_s25  ;;  %p1626_p13 = scmp.ne.s32.totalorder %s2200_s13, %s1625_s8 }
 0x2b6   : > { %s1811_s1 = smov [#allocation9]  }
 0x2b7   : > { %p1627_p2 = pnand %p1626_p13, %p1985_p7  ;;  %s1629_s30 = sshll.u32 %s1811_s1, 4  ;;  %s1630_s30 = int_to_ptr.vmem [resolvable:$false] %s1629_s30 }
 0x2b8   : > { %s1631_s9 = scalar_lea.vmem %s1630_s30, 256  ;;  %p1632_p11 = scmp.lt.s32.totalorder %s2200_s13, %s1630_s30 }
 0x2b9   : > { %p1628_p6 = pneg %p1627_p2  ;;  %p1633_p10 = scmp.lt.s32.totalorder %s1631_s9, %s1625_s8 }
 0x2bb   : > { %p1634_p1 = por %p1633_p10, %p1632_p11 }
 0x2bd   : > { %p1635_p8 = pnand %p1634_p1, %p1628_p6 }
 0x2bf   : > { %1638 = shalt.err (!%p1635_p8)
}
 0x2c0   : > { %s1639_s29 = scalar_lea.hbm %s2177_s16, 128  ;;  %s1643_s24 = scalar_lea.hbm %s2350_s4, 512 }
 0x2c1   : > { %p1640_p4 = scmp.ne.s32.totalorder %s2177_s16, %s1639_s29  ;;  %p1644_p5 = scmp.lt.u32.totalorder %s2177_s16, %s2350_s4 }
 0x2c2   : > { %p1645_p9 = scmp.lt.u32.totalorder %s1643_s24, %s1639_s29  ;;  %p1647_p13 = scmp.lt.u32.totalorder %s1639_s29, %s2177_s16 }
 0x2c3   : > { %p1641_p0 = pnand %p1640_p4, %p1985_p7 }
 0x2c4   : > { %p1646_p12 = por %p1645_p9, %p1644_p5 }
 0x2c5   : > { %p1642_p3 = pneg %p1641_p0 }
 0x2c6   : > { %p1648_p2 = por %p1647_p13, %p1646_p12 }
 0x2c8   : > { %p1649_p6 = pnand %p1648_p2, %p1642_p3 }
 0x2ca   : > { %1652 = shalt.err (!%p1649_p6)
}
 0x2cb   : > { %s1812_s20 = smov 128   ;;  %s1813_s27 = smov 4  }
 0x2cc   : > { %s2394_s25 = smov 64   ;;  %s983_s8 = scalar_lea.sflag [#allocation4], %s2047_s15 }
 0x2cd   : > { %1351 = dma.vmem_to_hbm [thread:$0]  (%p1985_p7), %s2200_s13, 128, %s2177_s16, %s2237_s19, %s2394_s25, %s1812_s20, %s1813_s27  }
 0x2ce   : > { %s1653_s1 = scalar_lea.vmem %s2209_s18, 128  ;;  %s1814_s30 = smov [#allocation8]  }
 0x2cf   : > { %p1654_p11 = scmp.ne.s32.totalorder %s2209_s18, %s1653_s1  ;;  %s1657_s9 = sshll.u32 %s1814_s30, 4  ;;  %s1658_s9 = int_to_ptr.vmem [resolvable:$false] %s1657_s9 }
 0x2d0   : > { %s1659_s29 = scalar_lea.vmem %s1658_s9, 256  ;;  %p1660_p8 = scmp.lt.s32.totalorder %s2209_s18, %s1658_s9 }
 0x2d1   : > { %p1655_p10 = pnand %p1654_p11, %p1985_p7  ;;  %p1661_p4 = scmp.lt.s32.totalorder %s1659_s29, %s1653_s1 }
 0x2d3   : > { %p1656_p1 = pneg %p1655_p10  ;;  %p1662_p0 = por %p1661_p4, %p1660_p8 }
 0x2d5   : > { %p1663_p3 = pnand %p1662_p0, %p1656_p1 }
 0x2d7   : > { %1666 = shalt.err (!%p1663_p3)
}
 0x2d8   : > { %s1667_s16 = scalar_lea.hbm %s2207_s17, 128  ;;  %s1671_s7 = scalar_lea.hbm %s2392_s0, 512 }
 0x2d9   : > { %p1668_p5 = scmp.ne.s32.totalorder %s2207_s17, %s1667_s16  ;;  %p1672_p13 = scmp.lt.u32.totalorder %s2207_s17, %s2392_s0 }
 0x2da   : > { %p1673_p2 = scmp.lt.u32.totalorder %s1671_s7, %s1667_s16  ;;  %p1675_p11 = scmp.lt.u32.totalorder %s1667_s16, %s2207_s17 }
 0x2db   : > { %p1669_p9 = pnand %p1668_p5, %p1985_p7 }
 0x2dc   : > { %p1674_p6 = por %p1673_p2, %p1672_p13 }
 0x2dd   : > { %p1670_p12 = pneg %p1669_p9 }
 0x2de   : > { %p1676_p10 = por %p1675_p11, %p1674_p6 }
 0x2e0   : > { %p1677_p1 = pnand %p1676_p10, %p1670_p12 }
 0x2e2   : > { %1680 = shalt.err (!%p1677_p1)
}
 0x2e3   : > { %1350 = dma.vmem_to_hbm [thread:$0]  (%p1985_p7), %s2209_s18, 128, %s2207_s17, %s983_s8, %s2394_s25, %s1812_s20, %s1813_s27  }
 0x2e4   : > { %s1681_s10 = scalar_lea.vmem %s2168_s11, 128  ;;  %s1815_s1 = smov [#allocation11]  }
 0x2e5   : > { %p1682_p8 = scmp.ne.s32.totalorder %s2168_s11, %s1681_s10  ;;  %s1685_s30 = sshll.u32 %s1815_s1, 4  ;;  %s1686_s30 = int_to_ptr.vmem [resolvable:$false] %s1685_s30 }
 0x2e6   : > { %s1687_s9 = scalar_lea.vmem %s1686_s30, 256  ;;  %p1688_p3 = scmp.lt.s32.totalorder %s2168_s11, %s1686_s30 }
 0x2e7   : > { %p1683_p4 = pnand %p1682_p8, %p1985_p7  ;;  %p1689_p5 = scmp.lt.s32.totalorder %s1687_s9, %s1681_s10 }
 0x2e9   : > { %p1684_p0 = pneg %p1683_p4  ;;  %p1690_p9 = por %p1689_p5, %p1688_p3 }
 0x2eb   : > { %p1691_p12 = pnand %p1690_p9, %p1684_p0 }
 0x2ed   : > { %1694 = shalt.err (!%p1691_p12)
}
 0x2ee   : > { %s1695_s17 = scalar_lea.hbm %s2188_s3, 128  ;;  %s1699_s8 = scalar_lea.hbm %s2351_s5, 512 }
 0x2ef   : > { %p1696_p13 = scmp.ne.s32.totalorder %s2188_s3, %s1695_s17  ;;  %p1700_p11 = scmp.lt.u32.totalorder %s2188_s3, %s2351_s5 }
 0x2f0   : > { %p1701_p10 = scmp.lt.u32.totalorder %s1699_s8, %s1695_s17  ;;  %p1703_p8 = scmp.lt.u32.totalorder %s1695_s17, %s2188_s3 }
 0x2f1   : > { %p1697_p2 = pnand %p1696_p13, %p1985_p7 }
 0x2f2   : > { %p1702_p1 = por %p1701_p10, %p1700_p11 }
 0x2f3   : > { %p1698_p6 = pneg %p1697_p2 }
 0x2f4   : > { %p1704_p4 = por %p1703_p8, %p1702_p1 }
 0x2f6   : > { %p1705_p0 = pnand %p1704_p4, %p1698_p6 }
 0x2f8   : > { %1708 = shalt.err (!%p1705_p0)
}
 0x2f9   : > { %1352 = dma.vmem_to_hbm [thread:$0]  (%p1985_p7), %s2168_s11, 128, %s2188_s3, %s2237_s19, %s2394_s25, %s1812_s20, %s1813_s27  }
 0x2fa PF: > { %s2395_s13 = sld [smem:[#allocation19_spill]]  ;;  %s2396_s21 = sld [smem:[#allocation21_spill]] }
 0x2fb   : > { %p1387_p3 = scmp.ge.s32.totalorder %s1791_s28, 2 }
 0x300   : > { %s1076_s7 = sand.u32 1, %s2395_s13   ;;  %p2397_p5 = scmp.ne.s32.totalorder %s2396_s21, 0 }
 0x301   : > { %s1077_s24 = scalar_lea.sflag [#allocation4], %s1076_s7 }
 0x302   : > { %p1370_p9 = pnand %p1387_p3, %p2397_p5 }
 0x304   : > { %1750 = dma.done.wait (!%p1370_p9), %s1077_s24, 128  }
 0x305   : > { %1752 = vsyncadd (!%p1370_p9), %s1077_s24, 4294967168  ;;  %s2398_s14 = sadd.s32 4294967294, %s1791_s28  }
 0x306   : > { %s1085_s12 = sand.u32 1, %s2398_s14  }
 0x307   : > { %s1086_s10 = scalar_lea.sflag [#allocation10], %s1085_s12 }
 0x308   : > { %1754 = dma.done.wait (!%p1370_p9), %s1086_s10, 256  }
 0x309   : > { %1756 = vsyncadd (!%p1370_p9), %s1086_s10, 4294967040  ;;  %s1104_s1 = scalar_lea.sflag [#allocation13], %s1076_s7 }
 0x30a   : > { %1758 = dma.done.wait (!%p1370_p9), %s1104_s1, 64  }
 0x30b   : > { %1760 = vsyncadd (!%p1370_p9), %s1104_s1, 4294967232  ;;  %s30_s28 = sadd.s32 1, %s1791_s28   ;;  %s2399_s25 = sld [smem:[#allocation20_spill]] }
 0x30c   : > { %p27_p7 = scmp.ge.s32.totalorder %s30_s28, 6   ;;  %s2400_s11 = sld [smem:[#allocation22_spill]] }
 0x30d   : > { %s2401_s27 = sld [smem:[#allocation23_spill]]  ;;  %s2402_s21 = smov %s1767_s22 }
 0x30e   : > { %s2403_s22 = smov %s1771_s23  ;;  %s2404_s23 = smov %s2002_s2 }
 0x30f   : > { %s2405_s24 = smov %s1783_s26  ;;  %29 = sbr.rel (!%p27_p7) target bundleno = 18 (0x12), region = 138 }
 0x312   : > { %s2406_s26 = smov %s2400_s11 }
 0x316   :  { %1109 = vsyncpa [#allocation3], 1 }
 0x317   :  { %1111 = vsyncpa [#allocation3 + $0x1], 1 }
 0x318   :  { %1112 = vsyncpa [#allocation6], 1 }
 0x319   :  { %1113 = vsyncpa [#allocation4], 1 }
 0x31a   :  { %1115 = vsyncpa [#allocation4 + $0x1], 1 }
 0x31b   :  { %1116 = vsyncpa [#allocation10], 1 }
 0x31c   :  { %1118 = vsyncpa [#allocation10 + $0x1], 1 }
 0x31d   :  { %1119 = vsyncpa [#allocation13], 1 }
 0x31e   :  { %1121 = vsyncpa [#allocation13 + $0x1], 1 }

</bundles_post_ra>
